<compile_context>
chip_gen: v6e
topology: v6e:2x2x1
jax: 0.10.0
libtpu: 0.0.40
codegen_flags: <defaults>
</compile_context>

<pallas_src>
import math

import numpy as np

import jax
import jax.numpy as jnp
from jax import lax
from jax.experimental import pallas as pl
from jax.experimental.pallas import tpu as pltpu

D_MODEL = 32
NUM_HEADS = 4
D_K = D_MODEL // NUM_HEADS
D_FF = 64
LN_EPS = 1e-5
NEG_INF = -1e9


# ---------------------------------------------------------------------------
# In-kernel building blocks (operate on register values, all 2-D)
# ---------------------------------------------------------------------------
def _layer_norm(y, gamma, beta):
    mean = jnp.mean(y, axis=-1, keepdims=True)
    var = jnp.mean((y - mean) ** 2, axis=-1, keepdims=True)
    return (y - mean) * lax.rsqrt(var + LN_EPS) * gamma + beta


def _mha(x_q, x_kv, neg_mask, bd, seg, wq, bq, wk, bk, wv, bv, wo, bo):
    """All-heads multi-head attention with block-structured 2-D matmuls.

    x_q: (T, D); x_kv: (S, D); neg_mask: (T, H*S) bool (True => fill -1e9).
    bd:  (H*S, D) head selector, bd[h*S+s, j] = 1 iff column j belongs to head h.
    seg: (H*S, H) segment matrix, seg[h*S+s, h'] = 1 iff h == h'.
    The 1/sqrt(d_k) scale is pre-folded into wq/bq.
    """
    q = jnp.dot(x_q, wq, preferred_element_type=jnp.float32) + bq    # (T, D)
    k = jnp.dot(x_kv, wk, preferred_element_type=jnp.float32) + bk   # (S, D)
    v = jnp.dot(x_kv, wv, preferred_element_type=jnp.float32) + bv   # (S, D)

    # Stack keys/values per head along rows and zero the other heads' feature
    # columns -> every head's scores/context come out of plain 2-D matmuls.
    k_stack = jnp.concatenate([k] * NUM_HEADS, axis=0) * bd          # (H*S, D)
    v_stack = jnp.concatenate([v] * NUM_HEADS, axis=0) * bd          # (H*S, D)

    # scores[t, h*S + s] = q_h[t] . k_h[s]   (single MXU push, no transpose)
    scores = lax.dot_general(q, k_stack, (((1,), (1,)), ((), ())),
                             preferred_element_type=jnp.float32)      # (T, H*S)
    scores = jnp.where(neg_mask, NEG_INF, scores)

    # ONE softmax pass over the stacked scores.  A per-row (over all heads)
    # max is a valid shift for every head's softmax; per-head denominators
    # come from a tiny matmul against the segment matrix.
    m = jnp.max(scores, axis=-1, keepdims=True)                       # (T, 1)
    e = jnp.exp(scores - m)                                           # (T, H*S)
    denom = jnp.dot(e, seg, preferred_element_type=jnp.float32)       # (T, H)
    inv = pl.reciprocal(denom, approx=True)                           # EUP slot
    inv_full = lax.dot_general(inv, seg, (((1,), (1,)), ((), ())),
                               preferred_element_type=jnp.float32)    # (T, H*S)
    probs = e * inv_full

    # ctx[t, j] = sum_s probs_{head(j)}[t, s] * v[s, j] : heads recombine
    # directly into (T, D); no lane concatenation of per-head outputs.
    ctx = jnp.dot(probs, v_stack, preferred_element_type=jnp.float32)  # (T, D)
    return jnp.dot(ctx, wo, preferred_element_type=jnp.float32) + bo


def _decoder_layer_kernel(x_ref, enc_ref, tgt_mask_ref, src_mask_ref,
                          bd_s, seg_s, bd_c, seg_c,
                          swq, sbq, swk, sbk, swv, sbv, swo, sbo, g1, be1,
                          cwq, cbq, cwk, cbk, cwv, cbv, cwo, cbo, g2, be2,
                          w1, b1, w2, b2, g3, be3,
                          o_ref):
    x = x_ref[...].astype(jnp.float32)        # (T, D)
    enc = enc_ref[...].astype(jnp.float32)    # (S, D)

    # Hoisted mask compares; masks tiled lane-wise across heads once per step.
    tgt_neg = jnp.concatenate([tgt_mask_ref[...]] * NUM_HEADS, axis=1) == 0.0
    src_neg = jnp.concatenate([src_mask_ref[...]] * NUM_HEADS, axis=1) == 0.0

    # ---- self-attention + residual + LayerNorm 1
    attn = _mha(x, x, tgt_neg, bd_s[...], seg_s[...],
                swq[...], sbq[...], swk[...], sbk[...],
                swv[...], sbv[...], swo[...], sbo[...])
    x = _layer_norm(x + attn, g1[...], be1[...])

    # ---- cross-attention + residual + LayerNorm 2
    attn = _mha(x, enc, src_neg, bd_c[...], seg_c[...],
                cwq[...], cbq[...], cwk[...], cbk[...],
                cwv[...], cbv[...], cwo[...], cbo[...])
    x = _layer_norm(x + attn, g2[...], be2[...])

    # ---- position-wise FFN + residual + LayerNorm 3
    h = jnp.maximum(
        jnp.dot(x, w1[...], preferred_element_type=jnp.float32) + b1[...], 0.0)
    ff = jnp.dot(h, w2[...], preferred_element_type=jnp.float32) + b2[...]
    x = _layer_norm(x + ff, g3[...], be3[...])

    o_ref[...] = x.astype(o_ref.dtype)


# ---------------------------------------------------------------------------
# Wrapper: one pallas_call, grid over batch (parallel -> v7x uses both TCs)
# ---------------------------------------------------------------------------
def _head_selectors(kv_len):
    """Static head selector (H*kv, D) and segment matrix (H*kv, H)."""
    r = np.arange(NUM_HEADS * kv_len)
    bd = (r[:, None] // kv_len) == (np.arange(D_MODEL)[None, :] // D_K)
    seg = (r[:, None] // kv_len) == np.arange(NUM_HEADS)[None, :]
    return jnp.asarray(bd, jnp.float32), jnp.asarray(seg, jnp.float32)


def fold_attention_scale(params):
    """One-time weight transform: fold 1/sqrt(d_k) into W_q / b_q."""
    scale = 1.0 / math.sqrt(D_K)
    p = dict(params)
    for prefix in ("self", "cross"):
        p[f"{prefix}_wq"] = params[f"{prefix}_wq"] * scale
        p[f"{prefix}_bq"] = params[f"{prefix}_bq"] * scale
    return p


def decoder_layer(x, enc_output, src_mask, tgt_mask, params):
    """Pallas equivalent of DecoderLayer.forward (eval mode).

    `params` must already have the attention scale folded into the q
    projections (see fold_attention_scale); the kernel applies no 1/sqrt(d_k).
    """
    B, T, D = x.shape
    S = enc_output.shape[1]

    bd_self, seg_self = _head_selectors(T)
    bd_cross, seg_cross = _head_selectors(S)

    operands = (
        x, enc_output,
        tgt_mask.astype(jnp.float32), src_mask.astype(jnp.float32),
        bd_self, seg_self, bd_cross, seg_cross,
        params["self_wq"], params["self_bq"],
        params["self_wk"], params["self_bk"],
        params["self_wv"], params["self_bv"],
        params["self_wo"], params["self_bo"],
        params["ln1_gamma"], params["ln1_beta"],
        params["cross_wq"], params["cross_bq"],
        params["cross_wk"], params["cross_bk"],
        params["cross_wv"], params["cross_bv"],
        params["cross_wo"], params["cross_bo"],
        params["ln2_gamma"], params["ln2_beta"],
        params["ffn_w1"], params["ffn_b1"],
        params["ffn_w2"], params["ffn_b2"],
        params["ln3_gamma"], params["ln3_beta"],
    )

    def per_batch(rows, cols):
        return pl.BlockSpec((None, rows, cols), lambda b: (b, 0, 0))

    def replicated(a):
        nd = a.ndim
        return pl.BlockSpec(a.shape, lambda b, nd=nd: (0,) * nd)

    in_specs = [per_batch(T, D), per_batch(S, D),
                per_batch(T, T), per_batch(T, S)]
    in_specs += [replicated(a) for a in operands[4:]]

    out = pl.pallas_call(
        _decoder_layer_kernel,
        out_shape=jax.ShapeDtypeStruct((B, T, D), x.dtype),
        grid=(B,),
        in_specs=in_specs,
        out_specs=pl.BlockSpec((None, T, D), lambda b: (b, 0, 0)),
        compiler_params=pltpu.CompilerParams(
            dimension_semantics=("parallel",)),
    )(*operands)
    return out


# ---------------------------------------------------------------------------
# Pure-JAX reference (faithful port of the PyTorch module, unfolded params)
# ---------------------------------------------------------------------------
def _ref_mha(xq, xkv, mask, p, prefix):
    B, T, D = xq.shape
    S = xkv.shape[1]
    q = xq @ p[prefix + "_wq"] + p[prefix + "_bq"]
    k = xkv @ p[prefix + "_wk"] + p[prefix + "_bk"]
    v = xkv @ p[prefix + "_wv"] + p[prefix + "_bv"]
    q = q.reshape(B, T, NUM_HEADS, D_K).transpose(0, 2, 1, 3)
    k = k.reshape(B, S, NUM_HEADS, D_K).transpose(0, 2, 1, 3)
    v = v.reshape(B, S, NUM_HEADS, D_K).transpose(0, 2, 1, 3)
    scores = jnp.einsum("bhtd,bhsd->bhts", q, k) / math.sqrt(D_K)
    scores = jnp.where(mask[:, None, :, :] == 0, NEG_INF, scores)
    probs = jax.nn.softmax(scores, axis=-1)
    out = jnp.einsum("bhts,bhsd->bhtd", probs, v)
    out = out.transpose(0, 2, 1, 3).reshape(B, T, D)
    return out @ p[prefix + "_wo"] + p[prefix + "_bo"]


def _ref_ln(x, gamma, beta):
    mean = jnp.mean(x, axis=-1, keepdims=True)
    var = jnp.mean((x - mean) ** 2, axis=-1, keepdims=True)
    return (x - mean) / jnp.sqrt(var + LN_EPS) * gamma + beta


def ref_decoder_layer(x, enc_output, src_mask, tgt_mask, p):
    x = _ref_ln(x + _ref_mha(x, x, tgt_mask, p, "self"),
                p["ln1_gamma"], p["ln1_beta"])
    x = _ref_ln(x + _ref_mha(x, enc_output, src_mask, p, "cross"),
                p["ln2_gamma"], p["ln2_beta"])
    h = jnp.maximum(x @ p["ffn_w1"] + p["ffn_b1"], 0.0)
    ff = h @ p["ffn_w2"] + p["ffn_b2"]
    return _ref_ln(x + ff, p["ln3_gamma"], p["ln3_beta"])


# ---------------------------------------------------------------------------
# Deterministic parameter init (PyTorch Linear-style uniform, LN weight=1/bias=0)
# ---------------------------------------------------------------------------
def init_params(key):
    keys = jax.random.split(key, 16)
    it = iter(keys)

    def lin(k, din, dout):
        kw, kb = jax.random.split(k)
        bound = 1.0 / math.sqrt(din)
        w = jax.random.uniform(kw, (din, dout), jnp.float32, -bound, bound)
        b = jax.random.uniform(kb, (1, dout), jnp.float32, -bound, bound)
        return w, b

    p = {}
    for prefix in ("self", "cross"):
        for name in ("wq", "wk", "wv", "wo"):
            w, b = lin(next(it), D_MODEL, D_MODEL)
            p[f"{prefix}_{name}"] = w
            p[f"{prefix}_{name.replace('w', 'b')}"] = b
    p["ffn_w1"], p["ffn_b1"] = lin(next(it), D_MODEL, D_FF)
    p["ffn_w2"], p["ffn_b2"] = lin(next(it), D_FF, D_MODEL)
    for i in (1, 2, 3):
        p[f"ln{i}_gamma"] = jnp.ones((1, D_MODEL), jnp.float32)
        p[f"ln{i}_beta"] = jnp.zeros((1, D_MODEL), jnp.float32)
    return p


# ---------------------------------------------------------------------------
if __name__ == "__main__":
    B, T, S = 2, 8, 8

    root = jax.random.PRNGKey(0)
    kx, kenc, kp = jax.random.split(root, 3)
    x = jax.random.normal(kx, (B, T, D_MODEL), jnp.float32)
    enc_output = jax.random.normal(kenc, (B, S, D_MODEL), jnp.float32)
    params = init_params(kp)
    kernel_params = fold_attention_scale(params)   # one-time fold of 1/sqrt(d_k)

    # tgt_mask: causal; src_mask: per-batch valid lengths.
    tgt_mask = jnp.broadcast_to(
        jnp.tril(jnp.ones((T, T), jnp.float32)), (B, T, T))
    src_lens = jnp.array([S, S - 2], jnp.int32)
    src_mask = (jnp.arange(S)[None, None, :] < src_lens[:, None, None]
                ).astype(jnp.float32)
    src_mask = jnp.broadcast_to(src_mask, (B, T, S))

    out = decoder_layer(x, enc_output, src_mask, tgt_mask, kernel_params)
    out = jax.block_until_ready(out)

    ref = ref_decoder_layer(x, enc_output, src_mask, tgt_mask, params)
    assert out.shape == (B, T, D_MODEL)
    # Tolerance covers pl.reciprocal(approx=True) (~2^-12 relative error on the
    # softmax denominators); genuine math bugs would be orders of magnitude off.
    assert jnp.allclose(out, ref, atol=2e-3, rtol=2e-3), (
        float(jnp.max(jnp.abs(out - ref))))

    print("KERNEL_OK")
</pallas_src>

<mosaic_0001>
module attributes {stable_mosaic.version = 11 : i64} {
  func.func @_decoder_layer_kernel(%arg0: i32, %arg1: memref<1x8x32xf32, #tpu.memory_space<vmem>>, %arg2: memref<1x8x32xf32, #tpu.memory_space<vmem>>, %arg3: memref<1x8x8xf32, #tpu.memory_space<vmem>>, %arg4: memref<1x8x8xf32, #tpu.memory_space<vmem>>, %arg5: memref<32x32xf32, #tpu.memory_space<vmem>>, %arg6: memref<32x4xf32, #tpu.memory_space<vmem>>, %arg7: memref<32x32xf32, #tpu.memory_space<vmem>>, %arg8: memref<32x4xf32, #tpu.memory_space<vmem>>, %arg9: memref<32x32xf32, #tpu.memory_space<vmem>>, %arg10: memref<1x32xf32, #tpu.memory_space<vmem>>, %arg11: memref<32x32xf32, #tpu.memory_space<vmem>>, %arg12: memref<1x32xf32, #tpu.memory_space<vmem>>, %arg13: memref<32x32xf32, #tpu.memory_space<vmem>>, %arg14: memref<1x32xf32, #tpu.memory_space<vmem>>, %arg15: memref<32x32xf32, #tpu.memory_space<vmem>>, %arg16: memref<1x32xf32, #tpu.memory_space<vmem>>, %arg17: memref<1x32xf32, #tpu.memory_space<vmem>>, %arg18: memref<1x32xf32, #tpu.memory_space<vmem>>, %arg19: memref<32x32xf32, #tpu.memory_space<vmem>>, %arg20: memref<1x32xf32, #tpu.memory_space<vmem>>, %arg21: memref<32x32xf32, #tpu.memory_space<vmem>>, %arg22: memref<1x32xf32, #tpu.memory_space<vmem>>, %arg23: memref<32x32xf32, #tpu.memory_space<vmem>>, %arg24: memref<1x32xf32, #tpu.memory_space<vmem>>, %arg25: memref<32x32xf32, #tpu.memory_space<vmem>>, %arg26: memref<1x32xf32, #tpu.memory_space<vmem>>, %arg27: memref<1x32xf32, #tpu.memory_space<vmem>>, %arg28: memref<1x32xf32, #tpu.memory_space<vmem>>, %arg29: memref<32x64xf32, #tpu.memory_space<vmem>>, %arg30: memref<1x64xf32, #tpu.memory_space<vmem>>, %arg31: memref<64x32xf32, #tpu.memory_space<vmem>>, %arg32: memref<1x32xf32, #tpu.memory_space<vmem>>, %arg33: memref<1x32xf32, #tpu.memory_space<vmem>>, %arg34: memref<1x32xf32, #tpu.memory_space<vmem>>, %arg35: memref<1x8x32xf32, #tpu.memory_space<vmem>>) attributes {dimension_semantics = [#tpu.dimension_semantics<parallel>], iteration_bounds = array<i64: 2>, scalar_prefetch = 0 : i64, scratch_operands = 0 : i64, tpu.core_type = #tpu.core_type<tc>, window_params = [{transform_indices = @transform_0, window_bounds = array<i64: 1, 8, 32>}, {transform_indices = @transform_1, window_bounds = array<i64: 1, 8, 32>}, {transform_indices = @transform_2, window_bounds = array<i64: 1, 8, 8>}, {transform_indices = @transform_3, window_bounds = array<i64: 1, 8, 8>}, {pipeline_mode = #tpu.pipeline_mode<synchronous>, transform_indices = @transform_4, window_bounds = array<i64: 32, 32>}, {pipeline_mode = #tpu.pipeline_mode<synchronous>, transform_indices = @transform_5, window_bounds = array<i64: 32, 4>}, {pipeline_mode = #tpu.pipeline_mode<synchronous>, transform_indices = @transform_6, window_bounds = array<i64: 32, 32>}, {pipeline_mode = #tpu.pipeline_mode<synchronous>, transform_indices = @transform_7, window_bounds = array<i64: 32, 4>}, {pipeline_mode = #tpu.pipeline_mode<synchronous>, transform_indices = @transform_8, window_bounds = array<i64: 32, 32>}, {pipeline_mode = #tpu.pipeline_mode<synchronous>, transform_indices = @transform_9, window_bounds = array<i64: 1, 32>}, {pipeline_mode = #tpu.pipeline_mode<synchronous>, transform_indices = @transform_10, window_bounds = array<i64: 32, 32>}, {pipeline_mode = #tpu.pipeline_mode<synchronous>, transform_indices = @transform_11, window_bounds = array<i64: 1, 32>}, {pipeline_mode = #tpu.pipeline_mode<synchronous>, transform_indices = @transform_12, window_bounds = array<i64: 32, 32>}, {pipeline_mode = #tpu.pipeline_mode<synchronous>, transform_indices = @transform_13, window_bounds = array<i64: 1, 32>}, {pipeline_mode = #tpu.pipeline_mode<synchronous>, transform_indices = @transform_14, window_bounds = array<i64: 32, 32>}, {pipeline_mode = #tpu.pipeline_mode<synchronous>, transform_indices = @transform_15, window_bounds = array<i64: 1, 32>}, {pipeline_mode = #tpu.pipeline_mode<synchronous>, transform_indices = @transform_16, window_bounds = array<i64: 1, 32>}, {pipeline_mode = #tpu.pipeline_mode<synchronous>, transform_indices = @transform_17, window_bounds = array<i64: 1, 32>}, {pipeline_mode = #tpu.pipeline_mode<synchronous>, transform_indices = @transform_18, window_bounds = array<i64: 32, 32>}, {pipeline_mode = #tpu.pipeline_mode<synchronous>, transform_indices = @transform_19, window_bounds = array<i64: 1, 32>}, {pipeline_mode = #tpu.pipeline_mode<synchronous>, transform_indices = @transform_20, window_bounds = array<i64: 32, 32>}, {pipeline_mode = #tpu.pipeline_mode<synchronous>, transform_indices = @transform_21, window_bounds = array<i64: 1, 32>}, {pipeline_mode = #tpu.pipeline_mode<synchronous>, transform_indices = @transform_22, window_bounds = array<i64: 32, 32>}, {pipeline_mode = #tpu.pipeline_mode<synchronous>, transform_indices = @transform_23, window_bounds = array<i64: 1, 32>}, {pipeline_mode = #tpu.pipeline_mode<synchronous>, transform_indices = @transform_24, window_bounds = array<i64: 32, 32>}, {pipeline_mode = #tpu.pipeline_mode<synchronous>, transform_indices = @transform_25, window_bounds = array<i64: 1, 32>}, {pipeline_mode = #tpu.pipeline_mode<synchronous>, transform_indices = @transform_26, window_bounds = array<i64: 1, 32>}, {pipeline_mode = #tpu.pipeline_mode<synchronous>, transform_indices = @transform_27, window_bounds = array<i64: 1, 32>}, {pipeline_mode = #tpu.pipeline_mode<synchronous>, transform_indices = @transform_28, window_bounds = array<i64: 32, 64>}, {pipeline_mode = #tpu.pipeline_mode<synchronous>, transform_indices = @transform_29, window_bounds = array<i64: 1, 64>}, {pipeline_mode = #tpu.pipeline_mode<synchronous>, transform_indices = @transform_30, window_bounds = array<i64: 64, 32>}, {pipeline_mode = #tpu.pipeline_mode<synchronous>, transform_indices = @transform_31, window_bounds = array<i64: 1, 32>}, {pipeline_mode = #tpu.pipeline_mode<synchronous>, transform_indices = @transform_32, window_bounds = array<i64: 1, 32>}, {pipeline_mode = #tpu.pipeline_mode<synchronous>, transform_indices = @transform_33, window_bounds = array<i64: 1, 32>}, {transform_indices = @transform_34, window_bounds = array<i64: 1, 8, 32>}]} {
    %c0 = arith.constant 0 : index
    %c0_0 = arith.constant 0 : index
    %c0_1 = arith.constant 0 : index
    %0 = vector.load %arg1[%c0, %c0_0, %c0_1] : memref<1x8x32xf32, #tpu.memory_space<vmem>>, vector<1x8x32xf32>
    %1 = vector.shape_cast %0 : vector<1x8x32xf32> to vector<8x32xf32>
    %c0_2 = arith.constant 0 : index
    %c0_3 = arith.constant 0 : index
    %c0_4 = arith.constant 0 : index
    %2 = vector.load %arg2[%c0_2, %c0_3, %c0_4] : memref<1x8x32xf32, #tpu.memory_space<vmem>>, vector<1x8x32xf32>
    %3 = vector.shape_cast %2 : vector<1x8x32xf32> to vector<8x32xf32>
    %c0_5 = arith.constant 0 : index
    %c0_6 = arith.constant 0 : index
    %c0_7 = arith.constant 0 : index
    %4 = vector.load %arg3[%c0_5, %c0_6, %c0_7] : memref<1x8x8xf32, #tpu.memory_space<vmem>>, vector<1x8x8xf32>
    %5 = vector.shape_cast %4 : vector<1x8x8xf32> to vector<8x8xf32>
    %6 = tpu.concatenate %5, %5, %5, %5 in 1 : vector<8x8xf32>, vector<8x8xf32>, vector<8x8xf32>, vector<8x8xf32> -> vector<8x32xf32>
    %cst = arith.constant 0.000000e+00 : f32
    %7 = vector.broadcast %cst : f32 to vector<8x32xf32>
    %8 = arith.cmpf oeq, %6, %7 : vector<8x32xf32>
    %c0_8 = arith.constant 0 : index
    %c0_9 = arith.constant 0 : index
    %c0_10 = arith.constant 0 : index
    %9 = vector.load %arg4[%c0_8, %c0_9, %c0_10] : memref<1x8x8xf32, #tpu.memory_space<vmem>>, vector<1x8x8xf32>
    %10 = vector.shape_cast %9 : vector<1x8x8xf32> to vector<8x8xf32>
    %11 = tpu.concatenate %10, %10, %10, %10 in 1 : vector<8x8xf32>, vector<8x8xf32>, vector<8x8xf32>, vector<8x8xf32> -> vector<8x32xf32>
    %cst_11 = arith.constant 0.000000e+00 : f32
    %12 = vector.broadcast %cst_11 : f32 to vector<8x32xf32>
    %13 = arith.cmpf oeq, %11, %12 : vector<8x32xf32>
    %c0_12 = arith.constant 0 : index
    %c0_13 = arith.constant 0 : index
    %14 = vector.load %arg5[%c0_12, %c0_13] : memref<32x32xf32, #tpu.memory_space<vmem>>, vector<32x32xf32>
    %c0_14 = arith.constant 0 : index
    %c0_15 = arith.constant 0 : index
    %15 = vector.load %arg6[%c0_14, %c0_15] : memref<32x4xf32, #tpu.memory_space<vmem>>, vector<32x4xf32>
    %c0_16 = arith.constant 0 : index
    %c0_17 = arith.constant 0 : index
    %16 = vector.load %arg9[%c0_16, %c0_17] : memref<32x32xf32, #tpu.memory_space<vmem>>, vector<32x32xf32>
    %c0_18 = arith.constant 0 : index
    %c0_19 = arith.constant 0 : index
    %17 = vector.load %arg10[%c0_18, %c0_19] : memref<1x32xf32, #tpu.memory_space<vmem>>, vector<1x32xf32>
    %c0_20 = arith.constant 0 : index
    %c0_21 = arith.constant 0 : index
    %18 = vector.load %arg11[%c0_20, %c0_21] : memref<32x32xf32, #tpu.memory_space<vmem>>, vector<32x32xf32>
    %c0_22 = arith.constant 0 : index
    %c0_23 = arith.constant 0 : index
    %19 = vector.load %arg12[%c0_22, %c0_23] : memref<1x32xf32, #tpu.memory_space<vmem>>, vector<1x32xf32>
    %c0_24 = arith.constant 0 : index
    %c0_25 = arith.constant 0 : index
    %20 = vector.load %arg13[%c0_24, %c0_25] : memref<32x32xf32, #tpu.memory_space<vmem>>, vector<32x32xf32>
    %c0_26 = arith.constant 0 : index
    %c0_27 = arith.constant 0 : index
    %21 = vector.load %arg14[%c0_26, %c0_27] : memref<1x32xf32, #tpu.memory_space<vmem>>, vector<1x32xf32>
    %c0_28 = arith.constant 0 : index
    %c0_29 = arith.constant 0 : index
    %22 = vector.load %arg15[%c0_28, %c0_29] : memref<32x32xf32, #tpu.memory_space<vmem>>, vector<32x32xf32>
    %c0_30 = arith.constant 0 : index
    %c0_31 = arith.constant 0 : index
    %23 = vector.load %arg16[%c0_30, %c0_31] : memref<1x32xf32, #tpu.memory_space<vmem>>, vector<1x32xf32>
    %cst_32 = arith.constant dense<0.000000e+00> : vector<8x32xf32>
    %24 = tpu.matmul %1, %16, %cst_32 {dimension_numbers = #tpu.dot_dimension_numbers<[1], [0], [0], [1], [0, 0, 1, 1], [], []>} : vector<8x32xf32>, vector<32x32xf32>, vector<8x32xf32> -> vector<8x32xf32>
    %25 = vector.broadcast %17 : vector<1x32xf32> to vector<8x32xf32>
    %26 = arith.addf %24, %25 : vector<8x32xf32>
    %cst_33 = arith.constant dense<0.000000e+00> : vector<8x32xf32>
    %27 = tpu.matmul %1, %18, %cst_33 {dimension_numbers = #tpu.dot_dimension_numbers<[1], [0], [0], [1], [0, 0, 1, 1], [], []>} : vector<8x32xf32>, vector<32x32xf32>, vector<8x32xf32> -> vector<8x32xf32>
    %28 = vector.broadcast %19 : vector<1x32xf32> to vector<8x32xf32>
    %29 = arith.addf %27, %28 : vector<8x32xf32>
    %cst_34 = arith.constant dense<0.000000e+00> : vector<8x32xf32>
    %30 = tpu.matmul %1, %20, %cst_34 {dimension_numbers = #tpu.dot_dimension_numbers<[1], [0], [0], [1], [0, 0, 1, 1], [], []>} : vector<8x32xf32>, vector<32x32xf32>, vector<8x32xf32> -> vector<8x32xf32>
    %31 = vector.broadcast %21 : vector<1x32xf32> to vector<8x32xf32>
    %32 = arith.addf %30, %31 : vector<8x32xf32>
    %33 = tpu.concatenate %29, %29, %29, %29 in 0 : vector<8x32xf32>, vector<8x32xf32>, vector<8x32xf32>, vector<8x32xf32> -> vector<32x32xf32>
    %34 = arith.mulf %33, %14 : vector<32x32xf32>
    %35 = tpu.concatenate %32, %32, %32, %32 in 0 : vector<8x32xf32>, vector<8x32xf32>, vector<8x32xf32>, vector<8x32xf32> -> vector<32x32xf32>
    %36 = arith.mulf %35, %14 : vector<32x32xf32>
    %cst_35 = arith.constant dense<0.000000e+00> : vector<8x32xf32>
    %37 = tpu.matmul %26, %34, %cst_35 {dimension_numbers = #tpu.dot_dimension_numbers<[1], [1], [0], [0], [0, 0, 1, 0], [], []>} : vector<8x32xf32>, vector<32x32xf32>, vector<8x32xf32> -> vector<8x32xf32>
    %cst_36 = arith.constant -1.000000e+09 : f32
    %38 = vector.broadcast %cst_36 : f32 to vector<8x32xf32>
    %39 = arith.select %8, %38, %37 : vector<8x32xi1>, vector<8x32xf32>
    %cst_37 = arith.constant dense<0xFF800000> : vector<8xf32>
    %40 = vector.multi_reduction <maximumf>, %39, %cst_37 [1] : vector<8x32xf32> to vector<8xf32>
    %41 = vector.shape_cast %40 : vector<8xf32> to vector<8x1xf32>
    %42 = vector.broadcast %41 : vector<8x1xf32> to vector<8x32xf32>
    %43 = arith.subf %39, %42 : vector<8x32xf32>
    %44 = math.exp %43 : vector<8x32xf32>
    %cst_38 = arith.constant dense<0.000000e+00> : vector<8x4xf32>
    %45 = tpu.matmul %44, %15, %cst_38 {dimension_numbers = #tpu.dot_dimension_numbers<[1], [0], [0], [1], [0, 0, 1, 1], [], []>} : vector<8x32xf32>, vector<32x4xf32>, vector<8x4xf32> -> vector<8x4xf32>
    %46 = tpu.reciprocal %45 {approx = true} : vector<8x4xf32> -> vector<8x4xf32>
    %cst_39 = arith.constant dense<0.000000e+00> : vector<8x32xf32>
    %47 = tpu.matmul %46, %15, %cst_39 {dimension_numbers = #tpu.dot_dimension_numbers<[1], [1], [0], [0], [0, 0, 1, 0], [], []>} : vector<8x4xf32>, vector<32x4xf32>, vector<8x32xf32> -> vector<8x32xf32>
    %48 = arith.mulf %44, %47 : vector<8x32xf32>
    %cst_40 = arith.constant dense<0.000000e+00> : vector<8x32xf32>
    %49 = tpu.matmul %48, %36, %cst_40 {dimension_numbers = #tpu.dot_dimension_numbers<[1], [0], [0], [1], [0, 0, 1, 1], [], []>} : vector<8x32xf32>, vector<32x32xf32>, vector<8x32xf32> -> vector<8x32xf32>
    %cst_41 = arith.constant dense<0.000000e+00> : vector<8x32xf32>
    %50 = tpu.matmul %49, %22, %cst_41 {dimension_numbers = #tpu.dot_dimension_numbers<[1], [0], [0], [1], [0, 0, 1, 1], [], []>} : vector<8x32xf32>, vector<32x32xf32>, vector<8x32xf32> -> vector<8x32xf32>
    %51 = vector.broadcast %23 : vector<1x32xf32> to vector<8x32xf32>
    %52 = arith.addf %50, %51 : vector<8x32xf32>
    %53 = arith.addf %1, %52 : vector<8x32xf32>
    %c0_42 = arith.constant 0 : index
    %c0_43 = arith.constant 0 : index
    %54 = vector.load %arg17[%c0_42, %c0_43] : memref<1x32xf32, #tpu.memory_space<vmem>>, vector<1x32xf32>
    %c0_44 = arith.constant 0 : index
    %c0_45 = arith.constant 0 : index
    %55 = vector.load %arg18[%c0_44, %c0_45] : memref<1x32xf32, #tpu.memory_space<vmem>>, vector<1x32xf32>
    %cst_46 = arith.constant dense<0.000000e+00> : vector<8xf32>
    %56 = vector.multi_reduction <add>, %53, %cst_46 [1] : vector<8x32xf32> to vector<8xf32>
    %57 = vector.shape_cast %56 : vector<8xf32> to vector<8x1xf32>
    %cst_47 = arith.constant 3.200000e+01 : f32
    %58 = vector.broadcast %cst_47 : f32 to vector<8x1xf32>
    %59 = arith.divf %57, %58 : vector<8x1xf32>
    %60 = vector.broadcast %59 : vector<8x1xf32> to vector<8x32xf32>
    %61 = arith.subf %53, %60 : vector<8x32xf32>
    %62 = arith.mulf %61, %61 : vector<8x32xf32>
    %cst_48 = arith.constant dense<0.000000e+00> : vector<8xf32>
    %63 = vector.multi_reduction <add>, %62, %cst_48 [1] : vector<8x32xf32> to vector<8xf32>
    %64 = vector.shape_cast %63 : vector<8xf32> to vector<8x1xf32>
    %cst_49 = arith.constant 3.200000e+01 : f32
    %65 = vector.broadcast %cst_49 : f32 to vector<8x1xf32>
    %66 = arith.divf %64, %65 : vector<8x1xf32>
    %67 = vector.broadcast %59 : vector<8x1xf32> to vector<8x32xf32>
    %68 = arith.subf %53, %67 : vector<8x32xf32>
    %cst_50 = arith.constant 9.99999974E-6 : f32
    %69 = vector.broadcast %cst_50 : f32 to vector<8x1xf32>
    %70 = arith.addf %66, %69 : vector<8x1xf32>
    %71 = math.rsqrt %70 : vector<8x1xf32>
    %72 = vector.broadcast %71 : vector<8x1xf32> to vector<8x32xf32>
    %73 = arith.mulf %68, %72 : vector<8x32xf32>
    %74 = vector.broadcast %54 : vector<1x32xf32> to vector<8x32xf32>
    %75 = arith.mulf %73, %74 : vector<8x32xf32>
    %76 = vector.broadcast %55 : vector<1x32xf32> to vector<8x32xf32>
    %77 = arith.addf %75, %76 : vector<8x32xf32>
    %c0_51 = arith.constant 0 : index
    %c0_52 = arith.constant 0 : index
    %78 = vector.load %arg7[%c0_51, %c0_52] : memref<32x32xf32, #tpu.memory_space<vmem>>, vector<32x32xf32>
    %c0_53 = arith.constant 0 : index
    %c0_54 = arith.constant 0 : index
    %79 = vector.load %arg8[%c0_53, %c0_54] : memref<32x4xf32, #tpu.memory_space<vmem>>, vector<32x4xf32>
    %c0_55 = arith.constant 0 : index
    %c0_56 = arith.constant 0 : index
    %80 = vector.load %arg19[%c0_55, %c0_56] : memref<32x32xf32, #tpu.memory_space<vmem>>, vector<32x32xf32>
    %c0_57 = arith.constant 0 : index
    %c0_58 = arith.constant 0 : index
    %81 = vector.load %arg20[%c0_57, %c0_58] : memref<1x32xf32, #tpu.memory_space<vmem>>, vector<1x32xf32>
    %c0_59 = arith.constant 0 : index
    %c0_60 = arith.constant 0 : index
    %82 = vector.load %arg21[%c0_59, %c0_60] : memref<32x32xf32, #tpu.memory_space<vmem>>, vector<32x32xf32>
    %c0_61 = arith.constant 0 : index
    %c0_62 = arith.constant 0 : index
    %83 = vector.load %arg22[%c0_61, %c0_62] : memref<1x32xf32, #tpu.memory_space<vmem>>, vector<1x32xf32>
    %c0_63 = arith.constant 0 : index
    %c0_64 = arith.constant 0 : index
    %84 = vector.load %arg23[%c0_63, %c0_64] : memref<32x32xf32, #tpu.memory_space<vmem>>, vector<32x32xf32>
    %c0_65 = arith.constant 0 : index
    %c0_66 = arith.constant 0 : index
    %85 = vector.load %arg24[%c0_65, %c0_66] : memref<1x32xf32, #tpu.memory_space<vmem>>, vector<1x32xf32>
    %c0_67 = arith.constant 0 : index
    %c0_68 = arith.constant 0 : index
    %86 = vector.load %arg25[%c0_67, %c0_68] : memref<32x32xf32, #tpu.memory_space<vmem>>, vector<32x32xf32>
    %c0_69 = arith.constant 0 : index
    %c0_70 = arith.constant 0 : index
    %87 = vector.load %arg26[%c0_69, %c0_70] : memref<1x32xf32, #tpu.memory_space<vmem>>, vector<1x32xf32>
    %cst_71 = arith.constant dense<0.000000e+00> : vector<8x32xf32>
    %88 = tpu.matmul %77, %80, %cst_71 {dimension_numbers = #tpu.dot_dimension_numbers<[1], [0], [0], [1], [0, 0, 1, 1], [], []>} : vector<8x32xf32>, vector<32x32xf32>, vector<8x32xf32> -> vector<8x32xf32>
    %89 = vector.broadcast %81 : vector<1x32xf32> to vector<8x32xf32>
    %90 = arith.addf %88, %89 : vector<8x32xf32>
    %cst_72 = arith.constant dense<0.000000e+00> : vector<8x32xf32>
    %91 = tpu.matmul %3, %82, %cst_72 {dimension_numbers = #tpu.dot_dimension_numbers<[1], [0], [0], [1], [0, 0, 1, 1], [], []>} : vector<8x32xf32>, vector<32x32xf32>, vector<8x32xf32> -> vector<8x32xf32>
    %92 = vector.broadcast %83 : vector<1x32xf32> to vector<8x32xf32>
    %93 = arith.addf %91, %92 : vector<8x32xf32>
    %cst_73 = arith.constant dense<0.000000e+00> : vector<8x32xf32>
    %94 = tpu.matmul %3, %84, %cst_73 {dimension_numbers = #tpu.dot_dimension_numbers<[1], [0], [0], [1], [0, 0, 1, 1], [], []>} : vector<8x32xf32>, vector<32x32xf32>, vector<8x32xf32> -> vector<8x32xf32>
    %95 = vector.broadcast %85 : vector<1x32xf32> to vector<8x32xf32>
    %96 = arith.addf %94, %95 : vector<8x32xf32>
    %97 = tpu.concatenate %93, %93, %93, %93 in 0 : vector<8x32xf32>, vector<8x32xf32>, vector<8x32xf32>, vector<8x32xf32> -> vector<32x32xf32>
    %98 = arith.mulf %97, %78 : vector<32x32xf32>
    %99 = tpu.concatenate %96, %96, %96, %96 in 0 : vector<8x32xf32>, vector<8x32xf32>, vector<8x32xf32>, vector<8x32xf32> -> vector<32x32xf32>
    %100 = arith.mulf %99, %78 : vector<32x32xf32>
    %cst_74 = arith.constant dense<0.000000e+00> : vector<8x32xf32>
    %101 = tpu.matmul %90, %98, %cst_74 {dimension_numbers = #tpu.dot_dimension_numbers<[1], [1], [0], [0], [0, 0, 1, 0], [], []>} : vector<8x32xf32>, vector<32x32xf32>, vector<8x32xf32> -> vector<8x32xf32>
    %cst_75 = arith.constant -1.000000e+09 : f32
    %102 = vector.broadcast %cst_75 : f32 to vector<8x32xf32>
    %103 = arith.select %13, %102, %101 : vector<8x32xi1>, vector<8x32xf32>
    %cst_76 = arith.constant dense<0xFF800000> : vector<8xf32>
    %104 = vector.multi_reduction <maximumf>, %103, %cst_76 [1] : vector<8x32xf32> to vector<8xf32>
    %105 = vector.shape_cast %104 : vector<8xf32> to vector<8x1xf32>
    %106 = vector.broadcast %105 : vector<8x1xf32> to vector<8x32xf32>
    %107 = arith.subf %103, %106 : vector<8x32xf32>
    %108 = math.exp %107 : vector<8x32xf32>
    %cst_77 = arith.constant dense<0.000000e+00> : vector<8x4xf32>
    %109 = tpu.matmul %108, %79, %cst_77 {dimension_numbers = #tpu.dot_dimension_numbers<[1], [0], [0], [1], [0, 0, 1, 1], [], []>} : vector<8x32xf32>, vector<32x4xf32>, vector<8x4xf32> -> vector<8x4xf32>
    %110 = tpu.reciprocal %109 {approx = true} : vector<8x4xf32> -> vector<8x4xf32>
    %cst_78 = arith.constant dense<0.000000e+00> : vector<8x32xf32>
    %111 = tpu.matmul %110, %79, %cst_78 {dimension_numbers = #tpu.dot_dimension_numbers<[1], [1], [0], [0], [0, 0, 1, 0], [], []>} : vector<8x4xf32>, vector<32x4xf32>, vector<8x32xf32> -> vector<8x32xf32>
    %112 = arith.mulf %108, %111 : vector<8x32xf32>
    %cst_79 = arith.constant dense<0.000000e+00> : vector<8x32xf32>
    %113 = tpu.matmul %112, %100, %cst_79 {dimension_numbers = #tpu.dot_dimension_numbers<[1], [0], [0], [1], [0, 0, 1, 1], [], []>} : vector<8x32xf32>, vector<32x32xf32>, vector<8x32xf32> -> vector<8x32xf32>
    %cst_80 = arith.constant dense<0.000000e+00> : vector<8x32xf32>
    %114 = tpu.matmul %113, %86, %cst_80 {dimension_numbers = #tpu.dot_dimension_numbers<[1], [0], [0], [1], [0, 0, 1, 1], [], []>} : vector<8x32xf32>, vector<32x32xf32>, vector<8x32xf32> -> vector<8x32xf32>
    %115 = vector.broadcast %87 : vector<1x32xf32> to vector<8x32xf32>
    %116 = arith.addf %114, %115 : vector<8x32xf32>
    %117 = arith.addf %77, %116 : vector<8x32xf32>
    %c0_81 = arith.constant 0 : index
    %c0_82 = arith.constant 0 : index
    %118 = vector.load %arg27[%c0_81, %c0_82] : memref<1x32xf32, #tpu.memory_space<vmem>>, vector<1x32xf32>
    %c0_83 = arith.constant 0 : index
    %c0_84 = arith.constant 0 : index
    %119 = vector.load %arg28[%c0_83, %c0_84] : memref<1x32xf32, #tpu.memory_space<vmem>>, vector<1x32xf32>
    %cst_85 = arith.constant dense<0.000000e+00> : vector<8xf32>
    %120 = vector.multi_reduction <add>, %117, %cst_85 [1] : vector<8x32xf32> to vector<8xf32>
    %121 = vector.shape_cast %120 : vector<8xf32> to vector<8x1xf32>
    %cst_86 = arith.constant 3.200000e+01 : f32
    %122 = vector.broadcast %cst_86 : f32 to vector<8x1xf32>
    %123 = arith.divf %121, %122 : vector<8x1xf32>
    %124 = vector.broadcast %123 : vector<8x1xf32> to vector<8x32xf32>
    %125 = arith.subf %117, %124 : vector<8x32xf32>
    %126 = arith.mulf %125, %125 : vector<8x32xf32>
    %cst_87 = arith.constant dense<0.000000e+00> : vector<8xf32>
    %127 = vector.multi_reduction <add>, %126, %cst_87 [1] : vector<8x32xf32> to vector<8xf32>
    %128 = vector.shape_cast %127 : vector<8xf32> to vector<8x1xf32>
    %cst_88 = arith.constant 3.200000e+01 : f32
    %129 = vector.broadcast %cst_88 : f32 to vector<8x1xf32>
    %130 = arith.divf %128, %129 : vector<8x1xf32>
    %131 = vector.broadcast %123 : vector<8x1xf32> to vector<8x32xf32>
    %132 = arith.subf %117, %131 : vector<8x32xf32>
    %cst_89 = arith.constant 9.99999974E-6 : f32
    %133 = vector.broadcast %cst_89 : f32 to vector<8x1xf32>
    %134 = arith.addf %130, %133 : vector<8x1xf32>
    %135 = math.rsqrt %134 : vector<8x1xf32>
    %136 = vector.broadcast %135 : vector<8x1xf32> to vector<8x32xf32>
    %137 = arith.mulf %132, %136 : vector<8x32xf32>
    %138 = vector.broadcast %118 : vector<1x32xf32> to vector<8x32xf32>
    %139 = arith.mulf %137, %138 : vector<8x32xf32>
    %140 = vector.broadcast %119 : vector<1x32xf32> to vector<8x32xf32>
    %141 = arith.addf %139, %140 : vector<8x32xf32>
    %c0_90 = arith.constant 0 : index
    %c0_91 = arith.constant 0 : index
    %142 = vector.load %arg29[%c0_90, %c0_91] : memref<32x64xf32, #tpu.memory_space<vmem>>, vector<32x64xf32>
    %cst_92 = arith.constant dense<0.000000e+00> : vector<8x64xf32>
    %143 = tpu.matmul %141, %142, %cst_92 {dimension_numbers = #tpu.dot_dimension_numbers<[1], [0], [0], [1], [0, 0, 1, 1], [], []>} : vector<8x32xf32>, vector<32x64xf32>, vector<8x64xf32> -> vector<8x64xf32>
    %c0_93 = arith.constant 0 : index
    %c0_94 = arith.constant 0 : index
    %144 = vector.load %arg30[%c0_93, %c0_94] : memref<1x64xf32, #tpu.memory_space<vmem>>, vector<1x64xf32>
    %145 = vector.broadcast %144 : vector<1x64xf32> to vector<8x64xf32>
    %146 = arith.addf %143, %145 : vector<8x64xf32>
    %cst_95 = arith.constant 0.000000e+00 : f32
    %147 = vector.broadcast %cst_95 : f32 to vector<8x64xf32>
    %148 = arith.maximumf %146, %147 : vector<8x64xf32>
    %c0_96 = arith.constant 0 : index
    %c0_97 = arith.constant 0 : index
    %149 = vector.load %arg31[%c0_96, %c0_97] : memref<64x32xf32, #tpu.memory_space<vmem>>, vector<64x32xf32>
    %cst_98 = arith.constant dense<0.000000e+00> : vector<8x32xf32>
    %150 = tpu.matmul %148, %149, %cst_98 {dimension_numbers = #tpu.dot_dimension_numbers<[1], [0], [0], [1], [0, 0, 1, 1], [], []>} : vector<8x64xf32>, vector<64x32xf32>, vector<8x32xf32> -> vector<8x32xf32>
    %c0_99 = arith.constant 0 : index
    %c0_100 = arith.constant 0 : index
    %151 = vector.load %arg32[%c0_99, %c0_100] : memref<1x32xf32, #tpu.memory_space<vmem>>, vector<1x32xf32>
    %152 = vector.broadcast %151 : vector<1x32xf32> to vector<8x32xf32>
    %153 = arith.addf %150, %152 : vector<8x32xf32>
    %154 = arith.addf %141, %153 : vector<8x32xf32>
    %c0_101 = arith.constant 0 : index
    %c0_102 = arith.constant 0 : index
    %155 = vector.load %arg33[%c0_101, %c0_102] : memref<1x32xf32, #tpu.memory_space<vmem>>, vector<1x32xf32>
    %c0_103 = arith.constant 0 : index
    %c0_104 = arith.constant 0 : index
    %156 = vector.load %arg34[%c0_103, %c0_104] : memref<1x32xf32, #tpu.memory_space<vmem>>, vector<1x32xf32>
    %cst_105 = arith.constant dense<0.000000e+00> : vector<8xf32>
    %157 = vector.multi_reduction <add>, %154, %cst_105 [1] : vector<8x32xf32> to vector<8xf32>
    %158 = vector.shape_cast %157 : vector<8xf32> to vector<8x1xf32>
    %cst_106 = arith.constant 3.200000e+01 : f32
    %159 = vector.broadcast %cst_106 : f32 to vector<8x1xf32>
    %160 = arith.divf %158, %159 : vector<8x1xf32>
    %161 = vector.broadcast %160 : vector<8x1xf32> to vector<8x32xf32>
    %162 = arith.subf %154, %161 : vector<8x32xf32>
    %163 = arith.mulf %162, %162 : vector<8x32xf32>
    %cst_107 = arith.constant dense<0.000000e+00> : vector<8xf32>
    %164 = vector.multi_reduction <add>, %163, %cst_107 [1] : vector<8x32xf32> to vector<8xf32>
    %165 = vector.shape_cast %164 : vector<8xf32> to vector<8x1xf32>
    %cst_108 = arith.constant 3.200000e+01 : f32
    %166 = vector.broadcast %cst_108 : f32 to vector<8x1xf32>
    %167 = arith.divf %165, %166 : vector<8x1xf32>
    %168 = vector.broadcast %160 : vector<8x1xf32> to vector<8x32xf32>
    %169 = arith.subf %154, %168 : vector<8x32xf32>
    %cst_109 = arith.constant 9.99999974E-6 : f32
    %170 = vector.broadcast %cst_109 : f32 to vector<8x1xf32>
    %171 = arith.addf %167, %170 : vector<8x1xf32>
    %172 = math.rsqrt %171 : vector<8x1xf32>
    %173 = vector.broadcast %172 : vector<8x1xf32> to vector<8x32xf32>
    %174 = arith.mulf %169, %173 : vector<8x32xf32>
    %175 = vector.broadcast %155 : vector<1x32xf32> to vector<8x32xf32>
    %176 = arith.mulf %174, %175 : vector<8x32xf32>
    %177 = vector.broadcast %156 : vector<1x32xf32> to vector<8x32xf32>
    %178 = arith.addf %176, %177 : vector<8x32xf32>
    %c0_110 = arith.constant 0 : index
    %c0_111 = arith.constant 0 : index
    %c0_112 = arith.constant 0 : index
    %179 = vector.load %arg35[%c0_110, %c0_111, %c0_112] : memref<1x8x32xf32, #tpu.memory_space<vmem>>, vector<1x8x32xf32>
    %180 = vector.shape_cast %179 : vector<1x8x32xf32> to vector<8x32xf32>
    %181 = vector.shape_cast %178 : vector<8x32xf32> to vector<1x8x32xf32>
    tpu.vector_store %arg35[%c0_110, %c0_111, %c0_112], %181 {strides = array<i32>} : memref<1x8x32xf32, #tpu.memory_space<vmem>>, vector<1x8x32xf32>,
    return
  }
  func.func @transform_0(%arg0: i32) -> (i32, i32, i32) {
    %c0_i32 = arith.constant 0 : i32
    %c0_i32_0 = arith.constant 0 : i32
    %c0_i32_1 = arith.constant 0 : i32
    return %arg0, %c0_i32, %c0_i32_0 : i32, i32, i32
  }
  func.func @transform_1(%arg0: i32) -> (i32, i32, i32) {
    %c0_i32 = arith.constant 0 : i32
    %c0_i32_0 = arith.constant 0 : i32
    %c0_i32_1 = arith.constant 0 : i32
    return %arg0, %c0_i32, %c0_i32_0 : i32, i32, i32
  }
  func.func @transform_2(%arg0: i32) -> (i32, i32, i32) {
    %c0_i32 = arith.constant 0 : i32
    %c0_i32_0 = arith.constant 0 : i32
    %c0_i32_1 = arith.constant 0 : i32
    return %arg0, %c0_i32, %c0_i32_0 : i32, i32, i32
  }
  func.func @transform_3(%arg0: i32) -> (i32, i32, i32) {
    %c0_i32 = arith.constant 0 : i32
    %c0_i32_0 = arith.constant 0 : i32
    %c0_i32_1 = arith.constant 0 : i32
    return %arg0, %c0_i32, %c0_i32_0 : i32, i32, i32
  }
  func.func @transform_4(%arg0: i32) -> (i32, i32) {
    %c0_i32 = arith.constant 0 : i32
    %c0_i32_0 = arith.constant 0 : i32
    %c0_i32_1 = arith.constant 0 : i32
    return %c0_i32, %c0_i32_0 : i32, i32
  }
  func.func @transform_5(%arg0: i32) -> (i32, i32) {
    %c0_i32 = arith.constant 0 : i32
    %c0_i32_0 = arith.constant 0 : i32
    %c0_i32_1 = arith.constant 0 : i32
    return %c0_i32, %c0_i32_0 : i32, i32
  }
  func.func @transform_6(%arg0: i32) -> (i32, i32) {
    %c0_i32 = arith.constant 0 : i32
    %c0_i32_0 = arith.constant 0 : i32
    %c0_i32_1 = arith.constant 0 : i32
    return %c0_i32, %c0_i32_0 : i32, i32
  }
  func.func @transform_7(%arg0: i32) -> (i32, i32) {
    %c0_i32 = arith.constant 0 : i32
    %c0_i32_0 = arith.constant 0 : i32
    %c0_i32_1 = arith.constant 0 : i32
    return %c0_i32, %c0_i32_0 : i32, i32
  }
  func.func @transform_8(%arg0: i32) -> (i32, i32) {
    %c0_i32 = arith.constant 0 : i32
    %c0_i32_0 = arith.constant 0 : i32
    %c0_i32_1 = arith.constant 0 : i32
    return %c0_i32, %c0_i32_0 : i32, i32
  }
  func.func @transform_9(%arg0: i32) -> (i32, i32) {
    %c0_i32 = arith.constant 0 : i32
    %c0_i32_0 = arith.constant 0 : i32
    %c0_i32_1 = arith.constant 0 : i32
    return %c0_i32, %c0_i32_0 : i32, i32
  }
  func.func @transform_10(%arg0: i32) -> (i32, i32) {
    %c0_i32 = arith.constant 0 : i32
    %c0_i32_0 = arith.constant 0 : i32
    %c0_i32_1 = arith.constant 0 : i32
    return %c0_i32, %c0_i32_0 : i32, i32
  }
  func.func @transform_11(%arg0: i32) -> (i32, i32) {
    %c0_i32 = arith.constant 0 : i32
    %c0_i32_0 = arith.constant 0 : i32
    %c0_i32_1 = arith.constant 0 : i32
    return %c0_i32, %c0_i32_0 : i32, i32
  }
  func.func @transform_12(%arg0: i32) -> (i32, i32) {
    %c0_i32 = arith.constant 0 : i32
    %c0_i32_0 = arith.constant 0 : i32
    %c0_i32_1 = arith.constant 0 : i32
    return %c0_i32, %c0_i32_0 : i32, i32
  }
  func.func @transform_13(%arg0: i32) -> (i32, i32) {
    %c0_i32 = arith.constant 0 : i32
    %c0_i32_0 = arith.constant 0 : i32
    %c0_i32_1 = arith.constant 0 : i32
    return %c0_i32, %c0_i32_0 : i32, i32
  }
  func.func @transform_14(%arg0: i32) -> (i32, i32) {
    %c0_i32 = arith.constant 0 : i32
    %c0_i32_0 = arith.constant 0 : i32
    %c0_i32_1 = arith.constant 0 : i32
    return %c0_i32, %c0_i32_0 : i32, i32
  }
  func.func @transform_15(%arg0: i32) -> (i32, i32) {
    %c0_i32 = arith.constant 0 : i32
    %c0_i32_0 = arith.constant 0 : i32
    %c0_i32_1 = arith.constant 0 : i32
    return %c0_i32, %c0_i32_0 : i32, i32
  }
  func.func @transform_16(%arg0: i32) -> (i32, i32) {
    %c0_i32 = arith.constant 0 : i32
    %c0_i32_0 = arith.constant 0 : i32
    %c0_i32_1 = arith.constant 0 : i32
    return %c0_i32, %c0_i32_0 : i32, i32
  }
  func.func @transform_17(%arg0: i32) -> (i32, i32) {
    %c0_i32 = arith.constant 0 : i32
    %c0_i32_0 = arith.constant 0 : i32
    %c0_i32_1 = arith.constant 0 : i32
    return %c0_i32, %c0_i32_0 : i32, i32
  }
  func.func @transform_18(%arg0: i32) -> (i32, i32) {
    %c0_i32 = arith.constant 0 : i32
    %c0_i32_0 = arith.constant 0 : i32
    %c0_i32_1 = arith.constant 0 : i32
    return %c0_i32, %c0_i32_0 : i32, i32
  }
  func.func @transform_19(%arg0: i32) -> (i32, i32) {
    %c0_i32 = arith.constant 0 : i32
    %c0_i32_0 = arith.constant 0 : i32
    %c0_i32_1 = arith.constant 0 : i32
    return %c0_i32, %c0_i32_0 : i32, i32
  }
  func.func @transform_20(%arg0: i32) -> (i32, i32) {
    %c0_i32 = arith.constant 0 : i32
    %c0_i32_0 = arith.constant 0 : i32
    %c0_i32_1 = arith.constant 0 : i32
    return %c0_i32, %c0_i32_0 : i32, i32
  }
  func.func @transform_21(%arg0: i32) -> (i32, i32) {
    %c0_i32 = arith.constant 0 : i32
    %c0_i32_0 = arith.constant 0 : i32
    %c0_i32_1 = arith.constant 0 : i32
    return %c0_i32, %c0_i32_0 : i32, i32
  }
  func.func @transform_22(%arg0: i32) -> (i32, i32) {
    %c0_i32 = arith.constant 0 : i32
    %c0_i32_0 = arith.constant 0 : i32
    %c0_i32_1 = arith.constant 0 : i32
    return %c0_i32, %c0_i32_0 : i32, i32
  }
  func.func @transform_23(%arg0: i32) -> (i32, i32) {
    %c0_i32 = arith.constant 0 : i32
    %c0_i32_0 = arith.constant 0 : i32
    %c0_i32_1 = arith.constant 0 : i32
    return %c0_i32, %c0_i32_0 : i32, i32
  }
  func.func @transform_24(%arg0: i32) -> (i32, i32) {
    %c0_i32 = arith.constant 0 : i32
    %c0_i32_0 = arith.constant 0 : i32
    %c0_i32_1 = arith.constant 0 : i32
    return %c0_i32, %c0_i32_0 : i32, i32
  }
  func.func @transform_25(%arg0: i32) -> (i32, i32) {
    %c0_i32 = arith.constant 0 : i32
    %c0_i32_0 = arith.constant 0 : i32
    %c0_i32_1 = arith.constant 0 : i32
    return %c0_i32, %c0_i32_0 : i32, i32
  }
  func.func @transform_26(%arg0: i32) -> (i32, i32) {
    %c0_i32 = arith.constant 0 : i32
    %c0_i32_0 = arith.constant 0 : i32
    %c0_i32_1 = arith.constant 0 : i32
    return %c0_i32, %c0_i32_0 : i32, i32
  }
  func.func @transform_27(%arg0: i32) -> (i32, i32) {
    %c0_i32 = arith.constant 0 : i32
    %c0_i32_0 = arith.constant 0 : i32
    %c0_i32_1 = arith.constant 0 : i32
    return %c0_i32, %c0_i32_0 : i32, i32
  }
  func.func @transform_28(%arg0: i32) -> (i32, i32) {
    %c0_i32 = arith.constant 0 : i32
    %c0_i32_0 = arith.constant 0 : i32
    %c0_i32_1 = arith.constant 0 : i32
    return %c0_i32, %c0_i32_0 : i32, i32
  }
  func.func @transform_29(%arg0: i32) -> (i32, i32) {
    %c0_i32 = arith.constant 0 : i32
    %c0_i32_0 = arith.constant 0 : i32
    %c0_i32_1 = arith.constant 0 : i32
    return %c0_i32, %c0_i32_0 : i32, i32
  }
  func.func @transform_30(%arg0: i32) -> (i32, i32) {
    %c0_i32 = arith.constant 0 : i32
    %c0_i32_0 = arith.constant 0 : i32
    %c0_i32_1 = arith.constant 0 : i32
    return %c0_i32, %c0_i32_0 : i32, i32
  }
  func.func @transform_31(%arg0: i32) -> (i32, i32) {
    %c0_i32 = arith.constant 0 : i32
    %c0_i32_0 = arith.constant 0 : i32
    %c0_i32_1 = arith.constant 0 : i32
    return %c0_i32, %c0_i32_0 : i32, i32
  }
  func.func @transform_32(%arg0: i32) -> (i32, i32) {
    %c0_i32 = arith.constant 0 : i32
    %c0_i32_0 = arith.constant 0 : i32
    %c0_i32_1 = arith.constant 0 : i32
    return %c0_i32, %c0_i32_0 : i32, i32
  }
  func.func @transform_33(%arg0: i32) -> (i32, i32) {
    %c0_i32 = arith.constant 0 : i32
    %c0_i32_0 = arith.constant 0 : i32
    %c0_i32_1 = arith.constant 0 : i32
    return %c0_i32, %c0_i32_0 : i32, i32
  }
  func.func @transform_34(%arg0: i32) -> (i32, i32, i32) {
    %c0_i32 = arith.constant 0 : i32
    %c0_i32_0 = arith.constant 0 : i32
    %c0_i32_1 = arith.constant 0 : i32
    return %arg0, %c0_i32, %c0_i32_0 : i32, i32, i32
  }
}

</mosaic_0001>

<bundles_post_ra>
// kernel: tpu_custom_call.1
= control target key start
LH: loop header
LB: loop body
LE: loop exit
PB: predicated region body
PF: predicated region fallthrough
CT: control target
= control target key end

     0   :  { %s4243_s6 = smov 1   ;;  %s4244_s10 = smov 2   ;;  %s5068_s0 = inlined_call_operand.smem [shape: u32[35], index: -1, kind: input, shape index: {}] }
   0x1   :  { %s4306_s5 = sld [smem:[%s5068_s0]]   ;;  %s4245_s14 = smov 3  }
   0x2   :  { %s4311_s9 = sld [smem:[%s5068_s0 + %s4243_s6]]   ;;  %s4246_s18 = smov 4  }
   0x3   :  { %s4316_s13 = sld [smem:[%s5068_s0 + %s4244_s10]]   ;;  %s4247_s22 = smov 5  }
   0x4   :  { %s4321_s17 = sld [smem:[%s5068_s0 + %s4245_s14]]   ;;  %s4248_s26 = smov 6  }
   0x5   :  { %s4326_s21 = sld [smem:[%s5068_s0 + %s4246_s18]]   ;;  %s4249_s30 = smov 7  }
   0x6   :  { %s4331_s25 = sld [smem:[%s5068_s0 + %s4247_s22]]   ;;  %s4250_s4 = smov 8  }
   0x7   :  { %5106 = sst [smem:[#allocation33_spill]] %s4306_s5  ;;  %s4251_s10 = smov 9  }
   0x8   :  { %5107 = sst [smem:[#allocation34_spill]] %s4311_s9  ;;  %s4252_s15 = smov 10  }
   0x9   :  { %s4336_s29 = sld [smem:[%s5068_s0 + %s4248_s26]]   ;;  %s4253_s20 = smov 11  }
   0xa   :  { %s4341_s3 = sld [smem:[%s5068_s0 + %s4249_s30]]   ;;  %s4254_s26 = smov 12  }
   0xb   :  { %5108 = sst [smem:[#allocation35_spill]] %s4326_s21  ;;  %s4255_s1 = smov 13  }
   0xc   :  { %5109 = sst [smem:[#allocation36_spill]] %s4331_s25  ;;  %s4256_s7 = smov 14  }
   0xd   :  { %s4346_s8 = sld [smem:[%s5068_s0 + %s4250_s4]]   ;;  %s4258_s22 = smov 16  }
   0xe   :  { %s4351_s14 = sld [smem:[%s5068_s0 + %s4251_s10]]   ;;  %s4259_s28 = smov 17  }
   0xf   :  { %5110 = sst [smem:[#allocation37_spill]] %s4336_s29 }
  0x10   :  { %5111 = sst [smem:[#allocation38_spill]] %s4341_s3 }
  0x11   :  { %s4356_s19 = sld [smem:[%s5068_s0 + %s4252_s15]]   ;;  %s4257_s15 = smov 15  }
  0x12   :  { %s4361_s24 = sld [smem:[%s5068_s0 + %s4253_s20]]  }
  0x13   :  { %5112 = sst [smem:[#allocation39_spill]] %s4346_s8 }
  0x14   :  { %5113 = sst [smem:[#allocation40_spill]] %s4351_s14 }
  0x15   :  { %s4366_s30 = sld [smem:[%s5068_s0 + %s4254_s26]]  }
  0x16   :  { %s4371_s6 = sld [smem:[%s5068_s0 + %s4255_s1]]  }
  0x17   :  { %5114 = sst [smem:[#allocation41_spill]] %s4356_s19 }
  0x18   :  { %5115 = sst [smem:[#allocation42_spill]] %s4361_s24 }
  0x19   :  { %s4376_s12 = sld [smem:[%s5068_s0 + %s4256_s7]]   ;;  %s4260_s7 = smov 18  }
  0x1a   :  { %s4381_s20 = sld [smem:[%s5068_s0 + %s4257_s15]]   ;;  %s4261_s15 = smov 19  }
  0x1b   :  { %5116 = sst [smem:[#allocation43_spill]] %s4366_s30 }
  0x1c   :  { %s4386_s27 = sld [smem:[%s5068_s0 + %s4258_s22]]   ;;  %s4262_s22 = smov 20  }
  0x1d   :  { %s4391_s4 = sld [smem:[%s5068_s0 + %s4259_s28]]   ;;  %s4263_s28 = smov 21  }
  0x1e   :  { %s4396_s3 = sld [smem:[%s5068_s0 + %s4260_s7]]   ;;  %s4264_s7 = smov 22  }
  0x1f   :  { %5117 = sst [smem:[#allocation44_spill]] %s4376_s12 }
  0x20   :  { %5118 = sst [smem:[#allocation45_spill]] %s4381_s20 }
  0x21   :  { %s4401_s29 = sld [smem:[%s5068_s0 + %s4261_s15]]   ;;  %s4265_s15 = smov 23  }
  0x22   :  { %5119 = sst [smem:[#allocation46_spill]] %s4386_s27 }
  0x23   :  { %5120 = sst [smem:[#allocation47_spill]] %s4391_s4 }
  0x24   :  { %5121 = sst [smem:[#allocation48_spill]] %s4396_s3 }
  0x25   :  { %s4406_s27 = sld [smem:[%s5068_s0 + %s4262_s22]]   ;;  %s4266_s22 = smov 24  }
  0x26   :  { %s4411_s4 = sld [smem:[%s5068_s0 + %s4263_s28]]   ;;  %s4267_s28 = smov 25  }
  0x27   :  { %5122 = sst [smem:[#allocation49_spill]] %s4401_s29 }
  0x28   :  { %s4416_s12 = sld [smem:[%s5068_s0 + %s4264_s7]]   ;;  %s4268_s7 = smov 26  }
  0x29   :  { %s4421_s29 = sld [smem:[%s5068_s0 + %s4265_s15]]   ;;  %s4269_s15 = smov 27  }
  0x2a   :  { %s4426_s25 = sld [smem:[%s5068_s0 + %s4266_s22]]   ;;  %s4270_s22 = smov 28  }
  0x2b   :  { %5123 = sst [smem:[#allocation50_spill]] %s4406_s27 }
  0x2c   :  { %5124 = sst [smem:[#allocation51_spill]] %s4411_s4 }
  0x2d   :  { %s4431_s4 = sld [smem:[%s5068_s0 + %s4267_s28]]   ;;  %s4271_s28 = smov 29  }
  0x2e   :  { %s4436_s14 = sld [smem:[%s5068_s0 + %s4268_s7]]   ;;  %s4272_s7 = smov 30  }
  0x2f   :  { %5125 = sst [smem:[#allocation52_spill]] %s4421_s29 }
  0x30   :  { %5126 = sst [smem:[#allocation53_spill]] %s4426_s25 }
  0x31   :  { %s4441_s29 = sld [smem:[%s5068_s0 + %s4269_s15]]   ;;  %s4273_s15 = smov 31  }
  0x32   :  { %s4446_s21 = sld [smem:[%s5068_s0 + %s4270_s22]]   ;;  %s4274_s22 = smov 32  }
  0x33   :  { %5127 = sst [smem:[#allocation54_spill]] %s4431_s4 }
  0x34   :  { %5128 = sst [smem:[#allocation55_spill]] %s4436_s14 }
  0x35   :  { %s4451_s4 = sld [smem:[%s5068_s0 + %s4271_s28]]   ;;  %s4275_s28 = smov 33  }
  0x36   :  { %s4456_s14 = sld [smem:[%s5068_s0 + %s4272_s7]]   ;;  %s4276_s7 = smov 34  }
  0x37   :  { %5129 = sst [smem:[#allocation56_spill]] %s4441_s29 }
  0x38   :  { %s4461_s29 = sld [smem:[%s5068_s0 + %s4273_s15]]  }
  0x39   :  { %s4466_s8 = sld [smem:[%s5068_s0 + %s4274_s22]]  }
  0x3b   :  { %5130 = sst [smem:[#allocation57_spill]] %s4451_s4 }
  0x3c   :  { %5131 = sst [smem:[#allocation58_spill]] %s4456_s14 }
  0x3d   :  { %s4471_s4 = sld [smem:[%s5068_s0 + %s4275_s28]]  }
  0x3e   :  { %5132 = sst [smem:[#allocation59_spill]] %s4461_s29 }
  0x3f   :  { %5133 = sst [smem:[#allocation60_spill]] %s4466_s8 }
  0x40   :  { %s4476_s14 = sld [smem:[%s5068_s0 + %s4276_s7]]  }
  0x43   :  { %5134 = sst [smem:[#allocation61_spill]] %s4471_s4 }
  0x46   :  { %5135 = sst [smem:[#allocation62_spill]] %s4476_s14 }
  0x47   :  { %74 = vsyncpa [#allocation3], 0 }
  0x48   :  { %76 = vsyncpa [#allocation3 + $0x1], 0 }
  0x49   :  { %77 = vsyncpa [#allocation6], 0 }
  0x4a   :  { %79 = vsyncpa [#allocation6 + $0x1], 0 }
  0x4b   :  { %80 = vsyncpa [#allocation9], 0 }
  0x4c   :  { %82 = vsyncpa [#allocation9 + $0x1], 0 }
  0x4d   :  { %83 = vsyncpa [#allocation12], 0 }
  0x4e   :  { %84 = vsyncpa [#allocation15], 0 }
  0x4f   :  { %85 = vsyncpa [#allocation18], 0 }
  0x50   :  { %86 = vsyncpa [#allocation21], 0 }
  0x51   :  { %87 = vsyncpa [#allocation4], 0 }
  0x52   :  { %89 = vsyncpa [#allocation4 + $0x1], 0  ;;  %s4478_s15 = smov 0   ;;  %s4480_s16 = smov 0  }
  0x53   :  { %s4482_s18 = smov 0   ;;  %s4484_s0 = smov 0  }
  0x54 LB: > { %s5136_s5 = sld [smem:[#allocation33_spill]]  ;;  %s4277_s22 = smov [#allocation10]   ;;  %s4233_s16 = sphi %s4480_s16, %s5213_s16   ;;  %s4229_s15 = sphi %s4478_s15, %s5212_s15   ;;  %s4241_s0 = sphi %s4484_s0, %s5210_s0   ;;  %s4237_s18 = sphi %s4482_s18, %s5214_s18  }
  0x55   : > { %s5137_s9 = sld [smem:[#allocation34_spill]]  ;;  %s894_s23 = sshll.u32 %s4277_s22, 4  ;;  %s895_s23 = int_to_ptr.vmem [resolvable:$true] %s894_s23 }
  0x56   : > { %5138 = sst [smem:[#allocation63_spill]] %s4229_s15  ;;  %s4499_s26 = sadd.s32 4294967295, %s4241_s0  }
  0x57   : > { %5139 = sst [smem:[#allocation64_spill]] %s4499_s26  ;;  %p3208_p0 = scmp.ge.s32.totalorder %s4241_s0, 1 }
  0x58   : > { %p5077_p1 = scmp.eq.s32.totalorder %s4499_s26, 0  ;;  %p860_p2 = scmp.lt.s32.totalorder %s4241_s0, 3 }
  0x59   : > { %s4278_s1 = smov [#allocation11]   ;;  %s4279_s10 = smov [#allocation14]  }
  0x5a   : > { %p4504_p3 = pnand %p3208_p0, %p860_p2  ;;  %s904_s2 = sshll.u32 %s4278_s1, 4  ;;  %s4511_s2 = int_to_ptr.vmem [resolvable:$true] %s904_s2 }
  0x5b   : > { %s932_s11 = sshll.u32 %s4279_s10, 4  ;;  %s3814_s14 = scalar_lea.vmem %s895_s23, 16  ;;  %s4519_s11 = int_to_ptr.vmem [resolvable:$true] %s932_s11 }
  0x5c   : > { %s5140_s28 = scalar_select %p4504_p3, 1, 0 }
  0x5d   : > { %p3642_p5 = pneg %p4504_p3  ;;  %p3815_p8 = scmp.ne.s32.totalorder %s895_s23, %s3814_s14 }
  0x5e   : > { %s3821_s1 = scalar_lea.vmem %s895_s23, 32  ;;  %p3822_p11 = scmp.lt.s32.totalorder %s895_s23, %s895_s23 }
  0x5f   : > { %p4515_p6 = pnand %p3642_p5, %p5077_p1  ;;  %p3823_p12 = scmp.lt.s32.totalorder %s3821_s1, %s3814_s14 }
  0x61   : > { %s5141_s7 = scalar_select %p4515_p6, 1, 0 }
  0x62   : > { %p4523_p7 = pneg %p4515_p6  ;;  %p3824_p13 = por %p3823_p12, %p3822_p11 }
  0x64   : > { %s5142_s22 = scalar_select %p4523_p7, 1, 0 }
  0x65   : > { %p3817_p9 = pnand %p3815_p8, %p4523_p7 }
  0x67   : > { %p3818_p10 = pneg %p3817_p9 }
  0x69   : > { %p3825_p0 = pnand %p3824_p13, %p3818_p10 }
  0x6b   : > { %3828 = shalt.err (!%p3825_p0)
}
  0x6c   : > { %s5143_s24 = sld [smem:[#allocation42_spill]]  ;;  %s3840_s10 = scalar_lea.vmem %s4511_s2, 512 }
  0x6d   : > { %p3841_p2 = scmp.ne.s32.totalorder %s4511_s2, %s3840_s10  ;;  %p3848_p9 = scmp.lt.s32.totalorder %s4511_s2, %s4511_s2 }
  0x6e   : > { %p3849_p4 = scmp.lt.s32.totalorder %s3840_s10, %s3840_s10 }
  0x6f   : > { %p3843_p5 = pnand %p3841_p2, %p4523_p7 }
  0x70   : > { %p3850_p1 = por %p3849_p4, %p3848_p9 }
  0x71   : > { %p3844_p8 = pneg %p3843_p5 }
  0x72   : > { %3645 = dma.hbm_to_vmem [thread:$0]  (!%p4515_p6), %s5143_s24, 16, %s895_s23, [#allocation9]  }
  0x73   : > { %p3851_p11 = pnand %p3850_p1, %p3844_p8 }
  0x75   : > { %3854 = shalt.err (!%p3851_p11)
}
  0x76   : > { %s5078_s14 = smov 128   ;;  %s5144_s30 = sld [smem:[#allocation43_spill]] }
  0x77   : > { %s5080_s23 = smov 8   ;;  %s3866_s1 = scalar_lea.vmem %s4519_s11, 16 }
  0x78   : > { %p3867_p10 = scmp.ne.s32.totalorder %s4519_s11, %s3866_s1  ;;  %s3873_s10 = scalar_lea.vmem %s4519_s11, 32 }
  0x79   : > { %p3874_p12 = scmp.lt.s32.totalorder %s4519_s11, %s4519_s11  ;;  %p3875_p13 = scmp.lt.s32.totalorder %s3873_s10, %s3866_s1 }
  0x7a   : > { %p3869_p1 = pnand %p3867_p10, %p4523_p7 }
  0x7b   : > { %p3876_p0 = por %p3875_p13, %p3874_p12 }
  0x7c   : > { %3648 = dma.hbm_to_vmem [thread:$0]  (!%p4515_p6), %s5144_s30, 512, %s4511_s2, [#allocation12], %s5078_s14, %s5078_s14, %s5080_s23  }
  0x7d   : > { %p3870_p4 = pneg %p3869_p1 }
  0x7f   : > { %p3877_p2 = pnand %p3876_p0, %p3870_p4 }
  0x81   : > { %3880 = shalt.err (!%p3877_p2)
}
  0x82   : > { %s5145_s20 = sld [smem:[#allocation45_spill]]  ;;  %s4282_s24 = smov [#allocation17]  }
  0x83   : > { %s964_s2 = sshll.u32 %s4282_s24, 4  ;;  %s4283_s14 = smov [#allocation20]   ;;  %s965_s2 = int_to_ptr.vmem [resolvable:$true] %s964_s2 }
  0x84   : > { %s996_s23 = sshll.u32 %s4283_s14, 4  ;;  %s3892_s30 = scalar_lea.vmem %s965_s2, 512  ;;  %s997_s23 = int_to_ptr.vmem [resolvable:$true] %s996_s23 }
  0x85   : > { %p3893_p5 = scmp.ne.s32.totalorder %s965_s2, %s3892_s30  ;;  %p3900_p11 = scmp.lt.s32.totalorder %s965_s2, %s965_s2 }
  0x86   : > { %p3901_p10 = scmp.lt.s32.totalorder %s3892_s30, %s3892_s30 }
  0x87   : > { %p3895_p8 = pnand %p3893_p5, %p4523_p7 }
  0x88   : > { %3654 = dma.hbm_to_vmem [thread:$0]  (!%p4515_p6), %s5145_s20, 16, %s4519_s11, [#allocation15]  }
  0x89   : > { %p3896_p9 = pneg %p3895_p8  ;;  %p3902_p1 = por %p3901_p10, %p3900_p11 }
  0x8b   : > { %p3903_p4 = pnand %p3902_p1, %p3896_p9 }
  0x8d   : > { %3906 = shalt.err (!%p3903_p4)
}
  0x8e   : > { %s5146_s1 = smov 8   ;;  %s5147_s10 = smov 128  }
  0x8f   : > { %s5148_s27 = sld [smem:[#allocation50_spill]]  ;;  %s3918_s24 = scalar_lea.vmem %s997_s23, 512 }
  0x90   : > { %p3919_p12 = scmp.ne.s32.totalorder %s997_s23, %s3918_s24  ;;  %p3926_p2 = scmp.lt.s32.totalorder %s997_s23, %s997_s23 }
  0x91   : > { %p3927_p5 = scmp.lt.s32.totalorder %s3918_s24, %s3918_s24 }
  0x92   : > { %p3921_p13 = pnand %p3919_p12, %p4523_p7 }
  0x93   : > { %p3928_p8 = por %p3927_p5, %p3926_p2 }
  0x94   : > { %p3922_p0 = pneg %p3921_p13 }
  0x95   : > { %3660 = dma.hbm_to_vmem [thread:$0]  (!%p4515_p6), %s5148_s27, 512, %s965_s2, [#allocation18], %s5147_s10, %s5147_s10, %s5146_s1  }
  0x96   : > { %p3929_p11 = pnand %p3928_p8, %p3922_p0 }
  0x98   : > { %3932 = shalt.err (!%p3929_p11)
}
  0x99   : > { %s5149_s25 = sld [smem:[#allocation53_spill]]  ;;  %s3207_s30 = sadd.s32 4294967294, %s4241_s0  }
  0x9a   : > { %s4574_s11 = sadd.s32 1, %s4241_s0   ;;  %s102_s14 = sadd.s32 1, %s4237_s18 }
  0x9b   : > { %5150 = sst [smem:[#allocation65_spill]] %s4574_s11  ;;  %s99_s2 = ssub.s32 %s4241_s0, %s4574_s11 }
  0x9c   : > { %p109_p9 = scmp.ne.s32.totalorder %s4237_s18, %s4233_s16  ;;  %p100_p10 = scmp.eq.s32.totalorder %s99_s2, 0 }
  0x9d   : > { %p110_p1 = scmp.eq.s32.totalorder %s4241_s0, 0  ;;  %p115_p4 = scmp.ne.s32.totalorder %s4233_s16, %s4229_s15 }
  0x9e   : > { %p847_p12 = scmp.eq.s32.totalorder %s4499_s26, 1  ;;  %p5152_p0 = scmp.eq.s32.totalorder %s4499_s26, 0 }
  0x9f   : > { %3666 = dma.hbm_to_vmem [thread:$0]  (!%p4515_p6), %s5149_s25, 512, %s997_s23, [#allocation21], %s5147_s10, %s5147_s10, %s5146_s1  }
  0xa0   : > { %s4586_s24 = scalar_select %p100_p10, %s4237_s18, %s102_s14  }
  0xa1   : > { %p111_p13 = por %p110_p1, %p109_p9  ;;  %p4590_p2 = por %p5152_p0, %p115_p4 }
  0xa2   : > { %5151 = sst [smem:[#allocation66_spill]] %s4586_s24  ;;  %p4594_p5 = por %p847_p12, %p109_p9 }
  0xa3   : > { %s5153_s23 = scalar_select %p4590_p2, 1, 0 }
  0xa4   : > { %s5154_s20 = scalar_select %p4594_p5, 1, 0 }
  0xa5   : > { %p853_p8 = scmp.eq.s32.totalorder %s3207_s30, 1  ;;  %p3696_p11 = scmp.lt.s32.totalorder %s4241_s0, 2 }
  0xa6   : > { %5155 = sst [smem:[#allocation67_spill]] %s5154_s20  ;;  %s5087_s2 = sand.u32 1, %s4237_s18  }
  0xa7   : > { %p4600_p3 = por %p853_p8, %p115_p4  ;;  %s4606_s14 = sshll.u32 %s5087_s2, 3 }
  0xa8   : > { %s4609_s27 = sshll.u32 %s4241_s0, 7  ;;  %p4611_p9 = pnand %p3696_p11, %p111_p13 }
  0xa9   : > { %s5156_s25 = scalar_select %p4600_p3, 1, 0 }
  0xaa   : > { %s5158_s24 = scalar_select %p4611_p9, 1, 0 }
  0xab   : > { %5157 = sst [smem:[#allocation68_spill]] %s5156_s25  ;;  %s5092_s30 = sand.u32 1, %s4241_s0  }
  0xac   : > { %s4618_s11 = scalar_lea.hbm %s5137_s9, %s4609_s27  ;;  %s1069_s25 = scalar_lea.vmem [#allocation5], %s4606_s14 }
  0xad   : > { %s1076_s15 = sshll.u32 %s1069_s25, 4  ;;  %s4623_s2 = scalar_lea.sflag [#allocation6], %s5092_s30  ;;  %s1077_s15 = int_to_ptr.vmem [resolvable:$true] %s1076_s15 }
  0xae   : > { %s3933_s20 = scalar_lea.hbm %s4618_s11, 128  ;;  %p4629_p1 = pneg %p4611_p9 }
  0xaf   : > { %p3934_p10 = scmp.ne.s32.totalorder %s4618_s11, %s3933_s20  ;;  %s3938_s8 = scalar_lea.hbm %s5137_s9, 256 }
  0xb0   : > { %s5159_s4 = scalar_select %p4629_p1, 1, 0 }
  0xb1   : > { %p3936_p4 = pnand %p4629_p1, %p3934_p10  ;;  %p3939_p13 = scmp.lt.s32.totalorder %s4618_s11, %s5137_s9 }
  0xb2   : > { %p3940_p0 = scmp.lt.s32.totalorder %s3938_s8, %s3933_s20 }
  0xb3   : > { %p3937_p12 = pneg %p3936_p4 }
  0xb4   : > { %p3941_p8 = por %p3940_p0, %p3939_p13 }
  0xb6   : > { %p3942_p11 = pnand %p3941_p8, %p3937_p12 }
  0xb8   : > { %3945 = shalt.err (!%p3942_p11)
}
  0xb9   : > { %s3946_s25 = scalar_lea.vmem %s1077_s15, 128  ;;  %s4284_s30 = smov [#allocation5]  }
  0xba   : > { %p3947_p3 = scmp.ne.s32.totalorder %s1077_s15, %s3946_s25  ;;  %s3951_s29 = sshll.u32 %s4284_s30, 4  ;;  %s3952_s29 = int_to_ptr.vmem [resolvable:$false] %s3951_s29 }
  0xbb   : > { %s3953_s19 = scalar_lea.vmem %s3952_s29, 256  ;;  %p3954_p6 = scmp.lt.s32.totalorder %s1077_s15, %s3952_s29 }
  0xbc   : > { %p3949_p5 = pnand %p3947_p3, %p4629_p1  ;;  %p3955_p7 = scmp.lt.s32.totalorder %s3953_s19, %s3946_s25 }
  0xbe   : > { %p3950_p2 = pneg %p3949_p5  ;;  %p3956_p10 = por %p3955_p7, %p3954_p6 }
  0xc0   : > { %p3957_p4 = pnand %p3956_p10, %p3950_p2 }
  0xc2   : > { %3960 = shalt.err (!%p3957_p4)
}
  0xc3   : > { %3676 = dma.hbm_to_vmem [thread:$0]  (!%p4611_p9), %s4618_s11, 128, %s1077_s15, %s4623_s2  }
  0xc4   : > { %s4285_s8 = smov [#allocation13]   ;;  %s4286_s9 = smov [#allocation16]  }
  0xc5   : > { %s918_s20 = sshll.u32 %s4285_s8, 4  ;;  %s948_s26 = sshll.u32 %s4286_s9, 4  ;;  %s919_s20 = int_to_ptr.vmem [resolvable:$true] %s918_s20  ;;  %s949_s26 = int_to_ptr.vmem [resolvable:$true] %s948_s26 }
  0xc6   : > { %s3972_s30 = scalar_lea.vmem %s919_s20, 16  ;;  %p5160_p5 = scmp.ne.s32.totalorder %s5142_s22, 0 }
  0xc7   : > { %p3973_p3 = scmp.ne.s32.totalorder %s919_s20, %s3972_s30  ;;  %s3979_s29 = scalar_lea.vmem %s919_s20, 32 }
  0xc8   : > { %p3980_p6 = scmp.lt.s32.totalorder %s919_s20, %s919_s20  ;;  %p3981_p7 = scmp.lt.s32.totalorder %s3979_s29, %s3972_s30 }
  0xc9   : > { %p3975_p12 = pnand %p3973_p3, %p5160_p5 }
  0xca   : > { %p3982_p2 = por %p3981_p7, %p3980_p6 }
  0xcb   : > { %p3976_p13 = pneg %p3975_p12 }
  0xcd   : > { %p3983_p0 = pnand %p3982_p2, %p3976_p13 }
  0xcf   : > { %3986 = shalt.err (!%p3983_p0)
}
  0xd0   : > { %p5161_p8 = scmp.ne.s32.totalorder %s5141_s7, 0  ;;  %s3998_s19 = scalar_lea.vmem %s949_s26, 512 }
  0xd1   : > { %p3999_p11 = scmp.ne.s32.totalorder %s949_s26, %s3998_s19  ;;  %p4006_p9 = scmp.lt.s32.totalorder %s949_s26, %s949_s26 }
  0xd2   : > { %3651 = dma.hbm_to_vmem [thread:$0]  (!%p5161_p8), %s4371_s6, 16, %s919_s20, [#allocation12]  }
  0xd3   : > { %p4001_p10 = pnand %p3999_p11, %p5160_p5  ;;  %p4007_p1 = scmp.lt.s32.totalorder %s3998_s19, %s3998_s19 }
  0xd5   : > { %p4002_p4 = pneg %p4001_p10  ;;  %p4008_p3 = por %p4007_p1, %p4006_p9 }
  0xd7   : > { %p4009_p12 = pnand %p4008_p3, %p4002_p4 }
  0xd9   : > { %4012 = shalt.err (!%p4009_p12)
}
  0xda   : > { %s5162_s3 = sld [smem:[#allocation48_spill]]  ;;  %s4287_s9 = smov [#allocation19]  }
  0xdb   : > { %s980_s15 = sshll.u32 %s4287_s9, 4  ;;  %s4288_s11 = smov [#allocation22]   ;;  %s981_s15 = int_to_ptr.vmem [resolvable:$true] %s980_s15 }
  0xdc   : > { %s1018_s25 = sshll.u32 %s4288_s11, 4  ;;  %s4024_s8 = scalar_lea.vmem %s981_s15, 512  ;;  %s1019_s25 = int_to_ptr.vmem [resolvable:$true] %s1018_s25 }
  0xdd   : > { %p4025_p13 = scmp.ne.s32.totalorder %s981_s15, %s4024_s8  ;;  %p4032_p6 = scmp.lt.s32.totalorder %s981_s15, %s981_s15 }
  0xde   : > { %p4033_p7 = scmp.lt.s32.totalorder %s4024_s8, %s4024_s8 }
  0xdf   : > { %p4027_p9 = pnand %p4025_p13, %p5160_p5 }
  0xe0   : > { %3657 = dma.hbm_to_vmem [thread:$0]  (!%p5161_p8), %s5162_s3, 512, %s949_s26, [#allocation15], %s5147_s10, %s5147_s10, %s5146_s1  }
  0xe1   : > { %p4028_p1 = pneg %p4027_p9  ;;  %p4034_p2 = por %p4033_p7, %p4032_p6 }
  0xe3   : > { %p4035_p0 = pnand %p4034_p2, %p4028_p1 }
  0xe5   : > { %4038 = shalt.err (!%p4035_p0)
}
  0xe6   : > { %3663 = dma.hbm_to_vmem [thread:$0]  (!%p5161_p8), %s4416_s12, 512, %s981_s15, [#allocation18], %s5147_s10, %s5147_s10, %s5146_s1  }
  0xe7   : > { %s4050_s26 = scalar_lea.vmem %s1019_s25, 512  ;;  %p4058_p3 = scmp.lt.s32.totalorder %s1019_s25, %s1019_s25 }
  0xe8   : > { %p4051_p11 = scmp.ne.s32.totalorder %s1019_s25, %s4050_s26  ;;  %p4059_p12 = scmp.lt.s32.totalorder %s4050_s26, %s4050_s26 }
  0xea   : > { %p4053_p10 = pnand %p4051_p11, %p5160_p5  ;;  %p4060_p13 = por %p4059_p12, %p4058_p3 }
  0xec   : > { %p4054_p4 = pneg %p4053_p10 }
  0xee   : > { %p4061_p9 = pnand %p4060_p13, %p4054_p4 }
  0xf0   : > { %4064 = shalt.err (!%p4061_p9)
}
  0xf1   : > { %3669 = dma.hbm_to_vmem [thread:$0]  (!%p5161_p8), %s4446_s21, 512, %s1019_s25, [#allocation21], %s5147_s10, %s5147_s10, %s5146_s1  }
  0xf2   : > { %s4675_s22 = scalar_lea.hbm %s5136_s5, %s4609_s27  ;;  %s1051_s20 = scalar_lea.vmem [#allocation2], %s4606_s14 }
  0xf3   : > { %s1058_s30 = sshll.u32 %s1051_s20, 4  ;;  %s5163_s7 = sand.u32 1, %s4237_s18   ;;  %s1059_s30 = int_to_ptr.vmem [resolvable:$true] %s1058_s30 }
  0xf4   : > { %s1048_s29 = scalar_lea.sflag [#allocation3], %s5163_s7  ;;  %s4065_s19 = scalar_lea.hbm %s4675_s22, 128 }
  0xf5   : > { %p4066_p5 = scmp.ne.s32.totalorder %s4675_s22, %s4065_s19  ;;  %p5164_p1 = scmp.ne.s32.totalorder %s5159_s4, 0 }
  0xf6   : > { %s4070_s9 = scalar_lea.hbm %s5136_s5, 256  ;;  %p4071_p2 = scmp.lt.s32.totalorder %s4675_s22, %s5136_s5 }
  0xf7   : > { %p4068_p6 = pnand %p4066_p5, %p5164_p1  ;;  %p4072_p0 = scmp.lt.s32.totalorder %s4070_s9, %s4065_s19 }
  0xf9   : > { %p4069_p7 = pneg %p4068_p6  ;;  %p4073_p11 = por %p4072_p0, %p4071_p2 }
  0xfb   : > { %p4074_p8 = pnand %p4073_p11, %p4069_p7 }
  0xfd   : > { %4077 = shalt.err (!%p4074_p8)
}
  0xfe   : > { %s4078_s1 = scalar_lea.vmem %s1059_s30, 128  ;;  %s4289_s10 = smov [#allocation2]  }
  0xff   : > { %p4079_p10 = scmp.ne.s32.totalorder %s1059_s30, %s4078_s1  ;;  %s4083_s15 = sshll.u32 %s4289_s10, 4  ;;  %s4084_s15 = int_to_ptr.vmem [resolvable:$false] %s4083_s15 }
 0x100   : > { %s4085_s11 = scalar_lea.vmem %s4084_s15, 256  ;;  %p4086_p12 = scmp.lt.s32.totalorder %s1059_s30, %s4084_s15 }
 0x101   : > { %p4081_p4 = pnand %p4079_p10, %p5164_p1  ;;  %p4087_p13 = scmp.lt.s32.totalorder %s4085_s11, %s4078_s1 }
 0x103   : > { %p4082_p3 = pneg %p4081_p4  ;;  %p4088_p9 = por %p4087_p13, %p4086_p12 }
 0x105   : > { %p4089_p5 = pnand %p4088_p9, %p4082_p3 }
 0x107   : > { %4092 = shalt.err (!%p4089_p5)
}
 0x108   : > { %p5165_p6 = scmp.ne.s32.totalorder %s5158_s24, 0  ;;  %s1092_s25 = scalar_lea.hbm %s4316_s13, %s4609_s27 }
 0x109   : > { %s1087_s8 = scalar_lea.vmem [#allocation7], %s4606_s14  ;;  %s4093_s20 = scalar_lea.hbm %s1092_s25, 128 }
 0x10a   : > { %3673 = dma.hbm_to_vmem [thread:$0]  (!%p5165_p6), %s4675_s22, 128, %s1059_s30, %s1048_s29  }
 0x10b   : > { %s1094_s26 = sshll.u32 %s1087_s8, 4  ;;  %p4094_p7 = scmp.ne.s32.totalorder %s1092_s25, %s4093_s20  ;;  %s1095_s26 = int_to_ptr.vmem [resolvable:$true] %s1094_s26 }
 0x10c   : > { %s4098_s7 = scalar_lea.hbm %s4316_s13, 256  ;;  %p4099_p11 = scmp.lt.s32.totalorder %s1092_s25, %s4316_s13 }
 0x10d   : > { %p4096_p2 = pnand %p4094_p7, %p5164_p1  ;;  %p4100_p8 = scmp.lt.s32.totalorder %s4098_s7, %s4093_s20 }
 0x10f   : > { %p4097_p0 = pneg %p4096_p2  ;;  %p4101_p10 = por %p4100_p8, %p4099_p11 }
 0x111   : > { %p4102_p4 = pnand %p4101_p10, %p4097_p0 }
 0x113   : > { %4105 = shalt.err (!%p4102_p4)
}
 0x114   : > { %s4106_s19 = scalar_lea.vmem %s1095_s26, 128  ;;  %s4290_s22 = smov [#allocation7]  }
 0x115   : > { %p4107_p3 = scmp.ne.s32.totalorder %s1095_s26, %s4106_s19  ;;  %s4111_s30 = sshll.u32 %s4290_s22, 4  ;;  %s4112_s30 = int_to_ptr.vmem [resolvable:$false] %s4111_s30 }
 0x116   : > { %s4113_s29 = scalar_lea.vmem %s4112_s30, 256  ;;  %p4114_p9 = scmp.lt.s32.totalorder %s1095_s26, %s4112_s30 }
 0x117   : > { %p4109_p12 = pnand %p4107_p3, %p5164_p1  ;;  %p4115_p5 = scmp.lt.s32.totalorder %s4113_s29, %s4106_s19 }
 0x119   : > { %p4110_p13 = pneg %p4109_p12  ;;  %p4116_p7 = por %p4115_p5, %p4114_p9 }
 0x11b   : > { %p4117_p2 = pnand %p4116_p7, %p4110_p13 }
 0x11d   : > { %4120 = shalt.err (!%p4117_p2)
}
 0x11e   : > { %3679 = dma.hbm_to_vmem [thread:$0]  (!%p5165_p6), %s1092_s25, 128, %s1095_s26, %s4623_s2  }
 0x11f   : > { %s4706_s9 = scalar_lea.hbm %s4321_s17, %s4609_s27  ;;  %s1105_s1 = scalar_lea.vmem [#allocation8], %s4606_s14 }
 0x120   : > { %s1112_s10 = sshll.u32 %s1105_s1, 4  ;;  %s5166_s15 = sand.u32 1, %s4241_s0   ;;  %s1113_s10 = int_to_ptr.vmem [resolvable:$true] %s1112_s10 }
 0x121   : > { %s1102_s11 = scalar_lea.sflag [#allocation9], %s5166_s15  ;;  %s4121_s8 = scalar_lea.hbm %s4706_s9, 128 }
 0x122   : > { %p4122_p0 = scmp.ne.s32.totalorder %s4706_s9, %s4121_s8  ;;  %s4126_s20 = scalar_lea.hbm %s4321_s17, 256 }
 0x123   : > { %p4127_p10 = scmp.lt.s32.totalorder %s4706_s9, %s4321_s17  ;;  %p4128_p4 = scmp.lt.s32.totalorder %s4126_s20, %s4121_s8 }
 0x124   : > { %p4124_p11 = pnand %p4122_p0, %p5164_p1 }
 0x125   : > { %p4129_p3 = por %p4128_p4, %p4127_p10 }
 0x126   : > { %p4125_p8 = pneg %p4124_p11 }
 0x128   : > { %p4130_p12 = pnand %p4129_p3, %p4125_p8 }
 0x12a   : > { %4133 = shalt.err (!%p4130_p12)
}
 0x12b   : > { %s4134_s27 = scalar_lea.vmem %s1113_s10, 128  ;;  %s4291_s2 = smov [#allocation8]  }
 0x12c   : > { %p4135_p13 = scmp.ne.s32.totalorder %s1113_s10, %s4134_s27  ;;  %s4139_s14 = sshll.u32 %s4291_s2, 4  ;;  %s4140_s14 = int_to_ptr.vmem [resolvable:$false] %s4139_s14 }
 0x12d   : > { %s4141_s25 = scalar_lea.vmem %s4140_s14, 256  ;;  %p4142_p7 = scmp.lt.s32.totalorder %s1113_s10, %s4140_s14 }
 0x12e   : > { %p4137_p9 = pnand %p4135_p13, %p5164_p1  ;;  %p4143_p2 = scmp.lt.s32.totalorder %s4141_s25, %s4134_s27 }
 0x130   : > { %p4138_p5 = pneg %p4137_p9  ;;  %p4144_p0 = por %p4143_p2, %p4142_p7 }
 0x132   : > { %p4145_p11 = pnand %p4144_p0, %p4138_p5 }
 0x134   : > { %4148 = shalt.err (!%p4145_p11)
}
 0x135   : > { %3682 = dma.hbm_to_vmem [thread:$0]  (!%p5165_p6), %s4706_s9, 128, %s1113_s10, %s1102_s11  }
 0x136   : > { %p5167_p8 = scmp.ne.s32.totalorder %s5140_s28, 0 }
 0x137   : > { %s4726_s4 = sand.u32 (!%p5167_p8), 1, %s4233_s16   ;;  %p5168_p1 = scmp.ne.s32.totalorder (!%p5167_p8), %s5153_s23, 0 }
 0x138   : > { %1121 = sbr.rel (%p5167_p8) target bundleno = 4384 (0x1120), region = 156  ;;  %s4729_s26 = sshll.u32 (!%p5167_p8), %s4726_s4, 3 }
 0x139   : > { %s1124_s7 = scalar_lea.sflag (!%p5167_p8), [#allocation3], %s4726_s4  ;;  %s1127_s19 = scalar_lea.vmem (!%p5167_p8), [#allocation2], %s4729_s26 }
 0x13d   : > { %4192 = dma.done.wait (%p5168_p1), %s1124_s7, 128  }
 0x13e   : > { %4194 = vsyncadd (%p5168_p1), %s1124_s7, 4294967168  ;;  %s5169_s24 = sld [smem:[#allocation64_spill]]  ;;  %s1136_s30 = scalar_lea.vmem [#allocation5], %s4729_s26 }
 0x144   : > { %s1132_s28 = sand.u32 1, %s5169_s24  }
 0x145   : > { %s1133_s22 = scalar_lea.sflag [#allocation6], %s1132_s28 }
 0x146   : > { %4196 = dma.done.wait (%p5168_p1), %s1133_s22, 256  }
 0x147   : > { %4198 = vsyncadd (%p5168_p1), %s1133_s22, 4294967040  ;;  %s1145_s29 = scalar_lea.vmem [#allocation7], %s4729_s26  ;;  %s1151_s9 = scalar_lea.sflag [#allocation9], %s1132_s28 }
 0x148   : > { %s1154_s1 = scalar_lea.vmem [#allocation8], %s4729_s26 }
 0x149   : > { %4200 = dma.done.wait (%p5168_p1), %s1151_s9, 128  }
 0x14a   : > { %4202 = vsyncadd (%p5168_p1), %s1151_s9, 4294967168  ;;  %p5170_p6 = scmp.eq.s32.totalorder %s5169_s24, 0 }
 0x14c   : > { %4204 = dma.done.wait (%p5170_p6), [#allocation9], 16   ;;  %p5171_p10 = pmov %p5170_p6 }
 0x14d   : > { %p5172_p4 = pmov %p5170_p6 }
 0x14e   : > { %4206 = vsyncadd (%p5171_p10), [#allocation9], 4294967280 }
 0x14f   : > { %4208 = dma.done.wait (%p5172_p4), [#allocation12], 528   ;;  %p5173_p3 = pmov %p5172_p4 }
 0x151   : > { %4210 = vsyncadd (%p5173_p3), [#allocation12], 4294966768  ;;  %p5174_p12 = pmov %p5173_p3 }
 0x152   : > { %p5175_p13 = pmov %p5173_p3 }
 0x153   : > { %4212 = dma.done.wait (%p5174_p12), [#allocation15], 528  }
 0x154   : > { %4214 = vsyncadd (%p5175_p13), [#allocation15], 4294966768  ;;  %p5176_p9 = pmov %p5173_p3 }
 0x155   : > { %p5177_p5 = pmov %p5173_p3 }
 0x156   : > { %4216 = dma.done.wait (%p5176_p9), [#allocation18], 1024  }
 0x157   : > { %4218 = vsyncadd (%p5177_p5), [#allocation18], 4294966272  ;;  %p5178_p7 = pmov %p5173_p3 }
 0x158   : > { %p5179_p2 = pmov %p5173_p3 }
 0x159   : > { %4220 = dma.done.wait (%p5178_p7), [#allocation21], 1024  }
 0x15a   : > { %4222 = vsyncadd (%p5179_p2), [#allocation21], 4294966272  ;;  %s5180_s23 = sld [smem:[#allocation41_spill]]  ;;  %v4292_v0 = vmov 0.0   ;;  %vm4293_vm0 = vmmov 0   ;;  %v4787_v8 = vld [vmem:[%s1127_s19] sm:$0xff] }
 0x15b   : > { %s5181_s10 = sld [smem:[#allocation39_spill]]  ;;  %3401 = vmatprep.subr.mxu1 %v4292_v0  ;;  %3409 = vmatprep.mubr.msk.f32.mxu1 %vm4293_vm0, %v4292_v0  ;;  %vm1359_vm1 = vcmask 261120   ;;  %v1292_v10 = vld [vmem:[%s1145_s29] sm:$0xff]  ;;  %s4294_s8 = smov 8   ;;  %vm1303_vm2 = vcmask 64512   ;;  %vm1305_vm3 = vcmask 130048  }
 0x15c   : > { %3390 = vmatprep.subr.mxu0 %v4292_v0  ;;  %3398 = vmatprep.mubr.msk.f32.mxu0 %vm4293_vm0, %v4292_v0  ;;  %s5182_s15 = sld [smem:[#allocation35_spill]]  ;;  %s4295_s20 = smov 24   ;;  %v3244_v11 = vld [vmem:[#allocation10] ss:$0 sm:$0xff]  ;;  %vm1307_vm4 = vcmask 195584   ;;  %v1345_v38 = vld [vmem:[#allocation11 + $0x10] sm:$0xff] }
 0x15d   : > { %1294 = vrot.lane.b32.xlu0 %v1292_v10, %s4294_s8  ;;  %1300 = vrot.lane.b32.xlu1 %v1292_v10, %s4295_s20  ;;  %s4296_s27 = smov 16   ;;  %s5184_s2 = sld [smem:[#allocation40_spill]]  ;;  %v1346_v27 = vld [vmem:[#allocation11 + $0x18] sm:$0xff]  ;;  %v1344_v39 = vld [vmem:[#allocation11 + $0x8] sm:$0xff]  ;;  %v1343_v40 = vld [vmem:[#allocation11] sm:$0xff]  ;;  %vm1759_vm6 = vcmask 31744  }
 0x15e   : > { %s5185_s14 = sld [smem:[#allocation36_spill]]  ;;  %v3246_v49 = vld [vmem:[#allocation13] ss:$0 sm:$0xff]  ;;  %vm2833_vm8 = vcmask 523264   ;;  %s4297_s3 = smov [#allocation23]  }
 0x15f   : > { %s5186_s25 = sld [smem:[#allocation44_spill]]  ;;  %s4153_s5 = sshll.u32 %s4297_s3, 4  ;;  %s4154_s5 = int_to_ptr.vmem [resolvable:$false] %s4153_s5 }
 0x160   : > { %v1341_v1 = vld [vmem:[%s5180_s23 + $0x18] sm:$0xff]  ;;  %v1340_v2 = vld [vmem:[%s5180_s23 + $0x10] sm:$0xff]  ;;  %v1339_v4 = vld [vmem:[%s5180_s23 + $0x8] sm:$0xff]  ;;  %s5187_s7 = sld [smem:[#allocation51_spill]] }
 0x161   : > { %3402 = vmatpush3.msra.mxu1 %v1341_v1  ;;  %v1336_v3 = vld [vmem:[%s5181_s10 + $0x18] sm:$0xff]  ;;  %v1335_v5 = vld [vmem:[%s5181_s10 + $0x10] sm:$0xff]  ;;  %v1334_v6 = vld [vmem:[%s5181_s10 + $0x8] sm:$0xff]  ;;  %1297 = vrot.lane.b32.xlu0 %v1292_v10, %s4296_s27  ;;  %s5188_s19 = sld [smem:[#allocation37_spill]] }
 0x162   : > { %3403 = vmatprep.subr.mxu1 %v4292_v0  ;;  %3391 = vmatpush3.msra.mxu0 %v1336_v3  ;;  %v1338_v7 = vld [vmem:[%s5180_s23] sm:$0xff]  ;;  %s5183_s11 = smov %s5182_s15  ;;  %v4809_v12 = vld [vmem:[%s5182_s15 + $0x18] sm:$0xff]  ;;  %s5189_s28 = sld [smem:[#allocation46_spill]] }
 0x163   : > { %3404 = vmatpush3.msra.mxu1 %v1340_v2  ;;  %3392 = vmatprep.subr.mxu0 %v4292_v0  ;;  %v1333_v9 = vld [vmem:[%s5181_s10] sm:$0xff]  ;;  %v4813_v19 = vld [vmem:[%s5183_s11 + $0x10] sm:$0xff]  ;;  %v4819_v21 = vld [vmem:[%s5183_s11 + $0x8] sm:$0xff]  ;;  %s5190_s22 = sld [smem:[#allocation47_spill]] }
 0x164   : > { %3405 = vmatprep.subr.mxu1 %v4292_v0  ;;  %3393 = vmatpush3.msra.mxu0 %v1335_v5  ;;  %v4825_v23 = vld [vmem:[%s5183_s11] sm:$0xff]  ;;  %v1332_v41 = vld [vmem:[%s5185_s14 + $0x18] sm:$0xff]  ;;  %v1331_v42 = vld [vmem:[%s5185_s14 + $0x10] sm:$0xff]  ;;  %s5192_s29 = sld [smem:[#allocation38_spill]] }
 0x165   : > { %3406 = vmatpush3.msra.mxu1 %v1339_v4  ;;  %3394 = vmatprep.subr.mxu0 %v4292_v0  ;;  %v3242_v24 = vld [vmem:[%s5184_s2] ss:$0 sm:$0xff]  ;;  %v1330_v43 = vld [vmem:[%s5185_s14 + $0x8] sm:$0xff]  ;;  %v1351_v62 = vld [vmem:[%s5186_s25 + $0x18] sm:$0xff]  ;;  %s5193_s9 = sld [smem:[#allocation52_spill]] }
 0x166   : > { %3407 = vmatprep.subr.mxu1 %v4292_v0  ;;  %3395 = vmatpush3.msra.mxu0 %v1334_v6  ;;  %v1329_v44 = vld [vmem:[%s5185_s14] sm:$0xff]  ;;  %v1350_v1 = vld [vmem:[%s5186_s25 + $0x10] sm:$0xff]  ;;  %v1349_v2 = vld [vmem:[%s5186_s25 + $0x8] sm:$0xff]  ;;  %s5195_s15 = sld [smem:[#allocation58_spill]] }
 0x167   : > { %3408 = vmatpush3.msra.mxu1 %v1338_v7  ;;  %3396 = vmatprep.subr.mxu0 %v4292_v0  ;;  %v1348_v3 = vld [vmem:[%s5186_s25] sm:$0xff]  ;;  %s5199_s2 = sld [smem:[#allocation57_spill]] }
 0x168   : > { %3410 = vmatmul.mubr.msk.f32.vlgmr.msra.gmra.mxu1 %vm1359_vm1, %v4787_v8  ;;  %3397 = vmatpush3.msra.mxu0 %v1333_v9  ;;  %v3260_v6 = vld [vmem:[#allocation14] ss:$0 sm:$0xff] }
 0x169   : > { %3399 = vmatmul.mubr.msk.f32.vlgmr.msra.gmra.mxu0 %vm1359_vm1, %v4787_v8  ;;  %3423 = vmatprep.subr.mxu1 %v4292_v0 }
 0x16a   : > { %3431 = vmatprep.mubr.msk.f32.mxu1 %vm4293_vm0, %v4292_v0  ;;  %3412 = vmatprep.subr.mxu0 %v4292_v0 }
 0x16b   : > { %3420 = vmatprep.mubr.msk.f32.mxu0 %vm4293_vm0, %v4292_v0  ;;  %3413 = vmatpush3.msra.mxu0 %v1346_v27  ;;  %v4913_v27 = vld [vmem:[%s5188_s19 + $0x18] sm:$0xff] }
 0x16c   : > { %3414 = vmatprep.subr.mxu0 %v4292_v0 }
 0x16d   : > { %3415 = vmatpush3.msra.mxu0 %v1345_v38 }
 0x16e   : > { %3416 = vmatprep.subr.mxu0 %v4292_v0 }
 0x16f   : > { %3417 = vmatpush3.msra.mxu0 %v1344_v39 }
 0x170   : > { %3418 = vmatprep.subr.mxu0 %v4292_v0 }
 0x171   : > { %3419 = vmatpush3.msra.mxu0 %v1343_v40 }
 0x172   : > { %3421 = vmatmul.mubr.msk.f32.vlgmr.msra.gmra.mxu0 %vm1359_vm1, %v4787_v8  ;;  %3434 = vmatprep.subr.mxu0 %v4292_v0 }
 0x173   : > { %3435 = vmatpush3.msra.mxu0 %v1332_v41  ;;  %3442 = vmatprep.mubr.msk.f32.mxu0 %vm4293_vm0, %v4292_v0 }
 0x174   : > { %3436 = vmatprep.subr.mxu0 %v4292_v0 }
 0x175   : > { %3437 = vmatpush3.msra.mxu0 %v1331_v42 }
 0x176   : > { %3438 = vmatprep.subr.mxu0 %v4292_v0 }
 0x177   : > { %3439 = vmatpush3.msra.mxu0 %v1330_v43 }
 0x178   : > { %3440 = vmatprep.subr.mxu0 %v4292_v0 }
 0x179   : > { %3441 = vmatpush3.msra.mxu0 %v1329_v44 }
 0x17a   : > { %3445 = vmatprep.subr.mxu0 %v4292_v0 }
 0x1cf   : > { %v1295_v28 = vpop.permute.xlu0 %1294  ;;  %v1301_v32 = vpop.permute.xlu1 %1300 }
 0x1d0   : > { %v1304_v29 = vsel %vm1303_vm2, %v1292_v10, %v1295_v28 }
 0x1d3   : > { %v1298_v30 = vpop.permute.xlu0 %1297 }
 0x1d4   : > { %v1306_v31 = vsel %vm1305_vm3, %v1304_v29, %v1298_v30  ;;  %v4916_v30 = vld [vmem:[%s5188_s19 + $0x10] sm:$0xff] }
 0x1d5   : > { %v1308_v33 = vsel %vm1307_vm4, %v1306_v31, %v1301_v32 }
 0x1d6   : > { %vm1309_vm5 = vcmp.eq.f32.partialorder %v1308_v33, 0.0 }
 0x228   : > { %v1505_v13 = vpop.f32.mrf.mxu1 }
 0x229   : > { %v1506_v14 = vadd.f32 %v3244_v11, %v1505_v13  ;;  %v1429_v15 = vpop.f32.mrf.mxu0  ;;  %v2045_v13 = vld [vmem:[#allocation17 + $0x18] sm:$0xff] }
 0x22a   : > { %v3411_v16 = vpop.f32.mrf.mxu1  ;;  %v1430_v26 = vadd.f32 %v3242_v24, %v1429_v15  ;;  %v2043_v15 = vld [vmem:[#allocation17 + $0x8] sm:$0xff] }
 0x22b   : > { %v1588_v17 = vmul.f32 %v1506_v14, %v4809_v12  ;;  %v3400_v18 = vpop.f32.mrf.mxu0  ;;  %v1587_v20 = vmul.f32 %v1506_v14, %v4813_v19  ;;  %v1586_v22 = vmul.f32 %v1506_v14, %v4819_v21  ;;  %v1585_v25 = vmul.f32 %v1506_v14, %v4825_v23  ;;  %v2044_v14 = vld [vmem:[#allocation17 + $0x10] sm:$0xff]  ;;  %v2042_v16 = vld [vmem:[#allocation17] sm:$0xff]  ;;  %v2038_v24 = vld [vmem:[#allocation16 + $0x8] sm:$0xff] }
 0x22d   : > { %3424 = vmatpush3.xpose.msk.msra.mxu1 %vm1359_vm1, %v1588_v17  ;;  %v4898_v17 = vld [vmem:[%s1136_s30] sm:$0xff]  ;;  %s5191_s30 = sld [smem:[#allocation49_spill]] }
 0x22e   : > { %3425 = vmatprep.subr.mxu1 %v4292_v0 }
 0x231   : > { %3426 = vmatpush3.xpose.msk.msra.mxu1 %vm1359_vm1, %v1587_v20 }
 0x232   : > { %3427 = vmatprep.subr.mxu1 %v4292_v0  ;;  %v1581_v50 = vpop.f32.mrf.mxu0 }
 0x233   : > { %v1582_v51 = vadd.f32 %v3246_v49, %v1581_v50 }
 0x234   : > { %v3422_v52 = vpop.f32.mrf.mxu0 }
 0x235   : > { %3428 = vmatpush3.xpose.msk.msra.mxu1 %vm1359_vm1, %v1586_v22  ;;  %v1592_v53 = vmul.f32 %v1582_v51, %v4809_v12  ;;  %v1591_v54 = vmul.f32 %v1582_v51, %v4813_v19  ;;  %v1590_v55 = vmul.f32 %v1582_v51, %v4819_v21  ;;  %v1589_v56 = vmul.f32 %v1582_v51, %v4825_v23  ;;  %v2040_v22 = vld [vmem:[#allocation16 + $0x18] sm:$0xff]  ;;  %v2039_v23 = vld [vmem:[#allocation16 + $0x10] sm:$0xff] }
 0x236   : > { %3429 = vmatprep.subr.mxu1 %v4292_v0  ;;  %v2050_v52 = vld [vmem:[#allocation19 + $0x18] sm:$0xff] }
 0x239   : > { %3430 = vmatpush3.xpose.msk.msra.mxu1 %vm1359_vm1, %v1585_v25  ;;  %v2037_v25 = vld [vmem:[#allocation16] sm:$0xff] }
 0x23a   : > { %3456 = vmatprep.subr.mxu1 %v4292_v0 }
 0x23c   : > { %3432 = vmatmul.mubr.msk.f32.vlgmr.msra.gmra.mxu1 %vm1359_vm1, %v1430_v26  ;;  %v3266_v26 = vld [vmem:[%s5187_s7] ss:$0 sm:$0xff]  ;;  %s5200_s7 = sld [smem:[#allocation59_spill]] }
 0x23d   : > { %3464 = vmatprep.mubr.msk.f32.mxu1 %vm4293_vm0, %v4292_v0  ;;  %3457 = vmatpush3.msra.mxu1 %v1592_v53 }
 0x23e   : > { %3458 = vmatprep.subr.mxu1 %v4292_v0 }
 0x23f   : > { %3459 = vmatpush3.msra.mxu1 %v1591_v54 }
 0x240   : > { %3460 = vmatprep.subr.mxu1 %v4292_v0 }
 0x241   : > { %3461 = vmatpush3.msra.mxu1 %v1590_v55 }
 0x242   : > { %3462 = vmatprep.subr.mxu1 %v4292_v0 }
 0x243   : > { %3463 = vmatpush3.msra.mxu1 %v1589_v56 }
 0x244   : > { %3467 = vmatprep.subr.mxu1 %v4292_v0 }
 0x2fc   : > { %v1674_v34 = vpop.f32.mrf.mxu1 }
 0x2fd   : > { %v1678_v35 = vsel %vm1309_vm5, -1e+09, %v1674_v34  ;;  %v4922_v34 = vld [vmem:[%s5188_s19 + $0x8] sm:$0xff] }
 0x2fe   : > { %v3433_v36 = vpop.f32.mrf.mxu1  ;;  %v1679_v37 = vsel %vm1359_vm1, %v1678_v35, -inf }
 0x2ff   : > { %1680 = vmax.xlane.f32.xlu1 %v1679_v37  ;;  %v4928_v36 = vld [vmem:[%s5188_s19] sm:$0xff] }
 0x388   : > { %v1681_v45 = vpop.xlane.xlu1 %1680 }
 0x389   : > { %v1682_v46 = vsub.f32 %v1678_v35, %v1681_v45 }
 0x38b   : > { %v1683_v47 = vmul.f32 1.442695, %v1682_v46 }
 0x38d   : > { %3789 = vpow2.f32 %v1683_v47  ;;  %v1310_v47 = vld [vmem:[%s1154_s1] sm:$0xff]  ;;  %s5194_s1 = sld [smem:[#allocation54_spill]] }
 0x38e   : > { %1312 = vrot.lane.b32.xlu1 %v1310_v47, %s4294_s8  ;;  %s5196_s8 = smov %s5195_s15 }
 0x392   : > { %1318 = vrot.lane.b32.xlu1 %v1310_v47, %s4295_s20  ;;  %s5197_s20 = sld [smem:[#allocation55_spill]] }
 0x39a   : > { %v3790_v48 = vpop.eup %3789 }
 0x39b   : > { %3443 = vmatmul.mubr.msk.f32.vlgmr.msra.gmra.mxu0 %vm1359_vm1, %v3790_v48 }
 0x39c   : > { %3453 = vmatprep.mubr.msk.f32.mxu0 %vm4293_vm0, %v4292_v0  ;;  %3446 = vmatpush3.xpose.msk.msra.mxu0 %vm1759_vm6, %v1332_v41 }
 0x39d   : > { %3447 = vmatprep.subr.mxu0 %v4292_v0 }
 0x3a0   : > { %3448 = vmatpush3.xpose.msk.msra.mxu0 %vm1759_vm6, %v1331_v42  ;;  %v3262_v42 = vld [vmem:[%s5189_s28] ss:$0 sm:$0xff]  ;;  %s5201_s28 = sld [smem:[#allocation60_spill]] }
 0x3a1   : > { %3449 = vmatprep.subr.mxu0 %v4292_v0 }
 0x3a4   : > { %3450 = vmatpush3.xpose.msk.msra.mxu0 %vm1759_vm6, %v1330_v43 }
 0x3a5   : > { %3451 = vmatprep.subr.mxu0 %v4292_v0 }
 0x3a8   : > { %3452 = vmatpush3.xpose.msk.msra.mxu0 %vm1759_vm6, %v1329_v44  ;;  %v3263_v44 = vld [vmem:[%s5190_s22] ss:$0 sm:$0xff]  ;;  %s5202_s22 = sld [smem:[#allocation61_spill]] }
 0x3a9   : > { %3478 = vmatprep.subr.mxu0 %v4292_v0 }
 0x400   : > { %v1313_v53 = vpop.permute.xlu1 %1312 }
 0x401   : > { %v1321_v54 = vsel %vm1303_vm2, %v1310_v47, %v1313_v53 }
 0x45b   : > { %v1754_v57 = vpop.f32.mrf.mxu0 }
 0x45c   : > { %3791 = vrcp.f32 %v1754_v57  ;;  %v1319_v57 = vpop.permute.xlu1 %1318 }
 0x45d   : > { %v3444_v58 = vpop.f32.mrf.mxu0 }
 0x469   : > { %v3792_v59 = vpop.eup %3791 }
 0x46a   : > { %3454 = vmatmul.mubr.msk.f32.vlgmr.msra.gmra.mxu0 %vm1759_vm6, %v3792_v59 }
 0x46b   : > { %3486 = vmatprep.mubr.msk.f32.mxu0 %vm4293_vm0, %v4292_v0  ;;  %3479 = vmatpush3.msra.mxu0 %v2040_v22 }
 0x46c   : > { %3480 = vmatprep.subr.mxu0 %v4292_v0 }
 0x46d   : > { %3481 = vmatpush3.msra.mxu0 %v2039_v23 }
 0x46e   : > { %3482 = vmatprep.subr.mxu0 %v4292_v0 }
 0x46f   : > { %3483 = vmatpush3.msra.mxu0 %v2038_v24  ;;  %v2055_v24 = vld [vmem:[#allocation20 + $0x18] sm:$0xff] }
 0x470   : > { %3484 = vmatprep.subr.mxu0 %v4292_v0 }
 0x471   : > { %3485 = vmatpush3.msra.mxu0 %v2037_v25 }
 0x472   : > { %3500 = vmatprep.subr.mxu0 %v4292_v0 }
 0x52a   : > { %v1841_v60 = vpop.f32.mrf.mxu0 }
 0x52b   : > { %v1845_v61 = vmul.f32 %v3790_v48, %v1841_v60  ;;  %v3264_v48 = vld [vmem:[%s5191_s30] ss:$0 sm:$0xff]  ;;  %s5203_s30 = sld [smem:[#allocation62_spill]] }
 0x52c   : > { %v3455_v63 = vpop.f32.mrf.mxu0 }
 0x52d   : > { %3465 = vmatmul.mubr.msk.f32.vlgmr.msra.gmra.mxu1 %vm1359_vm1, %v1845_v61  ;;  %v2049_v63 = vld [vmem:[#allocation19 + $0x10] sm:$0xff] }
 0x52e   : > { %3468 = vmatpush3.msra.mxu1 %v1351_v62  ;;  %3475 = vmatprep.mubr.msk.f32.mxu1 %vm4293_vm0, %v4292_v0 }
 0x52f   : > { %3469 = vmatprep.subr.mxu1 %v4292_v0 }
 0x530   : > { %3470 = vmatpush3.msra.mxu1 %v1350_v1  ;;  %v2048_v1 = vld [vmem:[#allocation19 + $0x8] sm:$0xff] }
 0x531   : > { %3471 = vmatprep.subr.mxu1 %v4292_v0 }
 0x532   : > { %3472 = vmatpush3.msra.mxu1 %v1349_v2  ;;  %v2047_v2 = vld [vmem:[#allocation19] sm:$0xff] }
 0x533   : > { %3473 = vmatprep.subr.mxu1 %v4292_v0 }
 0x534   : > { %3474 = vmatpush3.msra.mxu1 %v1348_v3  ;;  %v2036_v3 = vld [vmem:[%s5192_s29 + $0x18] sm:$0xff] }
 0x535   : > { %3489 = vmatprep.subr.mxu1 %v4292_v0 }
 0x5ed   : > { %v1915_v4 = vpop.f32.mrf.mxu1 }
 0x5ee   : > { %3476 = vmatmul.mubr.msk.f32.vlgmr.msra.gmra.mxu1 %vm1359_vm1, %v1915_v4  ;;  %v2035_v4 = vld [vmem:[%s5192_s29 + $0x10] sm:$0xff] }
 0x5ef   : > { %v3466_v5 = vpop.f32.mrf.mxu1  ;;  %3497 = vmatprep.mubr.msk.f32.mxu1 %vm4293_vm0, %v4292_v0  ;;  %3490 = vmatpush3.msra.mxu1 %v2045_v13 }
 0x5f0   : > { %3491 = vmatprep.subr.mxu1 %v4292_v0  ;;  %v2034_v5 = vld [vmem:[%s5192_s29 + $0x8] sm:$0xff] }
 0x5f1   : > { %3492 = vmatpush3.msra.mxu1 %v2044_v14 }
 0x5f2   : > { %3493 = vmatprep.subr.mxu1 %v4292_v0 }
 0x5f3   : > { %3494 = vmatpush3.msra.mxu1 %v2043_v15 }
 0x5f4   : > { %3495 = vmatprep.subr.mxu1 %v4292_v0 }
 0x5f5   : > { %3496 = vmatpush3.msra.mxu1 %v2042_v16 }
 0x5f6   : > { %3498 = vmatmul.mubr.msk.f32.vlgmr.msra.gmra.mxu1 %vm1359_vm1, %v4898_v17  ;;  %3511 = vmatprep.subr.mxu1 %v4292_v0 }
 0x5f7   : > { %3519 = vmatprep.mubr.msk.f32.mxu1 %vm4293_vm0, %v4292_v0 }
 0x6ae   : > { %v1994_v7 = vpop.f32.mrf.mxu1 }
 0x6af   : > { %v1995_v9 = vadd.f32 %v3260_v6, %v1994_v7  ;;  %v2033_v6 = vld [vmem:[%s5192_s29] sm:$0xff] }
 0x6b0   : > { %v3477_v10 = vpop.f32.mrf.mxu1 }
 0x6b1   : > { %v1998_v11 = vadd.f32 %v1995_v9, %v4787_v8 }
 0x6b3   : > { %v2001_v12 = vsel %vm1359_vm1, %v1998_v11, 0.0 }
 0x6b4   : > { %2002 = vadd.xlane.f32.xlu0 %v2001_v12  ;;  %v3268_v12 = vld [vmem:[%s5193_s9] ss:$0 sm:$0xff]  ;;  %s5204_s9 = sld [smem:[#allocation67_spill]] }
 0x6b6   : > { %v2211_v28 = vpop.f32.mrf.mxu1 }
 0x6b7   : > { %v2212_v29 = vadd.f32 %v3266_v26, %v2211_v28  ;;  %v2054_v26 = vld [vmem:[#allocation20 + $0x10] sm:$0xff]  ;;  %v2052_v28 = vld [vmem:[#allocation20] sm:$0xff] }
 0x6b8   : > { %v3499_v31 = vpop.f32.mrf.mxu1 }
 0x6b9   : > { %v2294_v32 = vmul.f32 %v2212_v29, %v4913_v27  ;;  %v2293_v33 = vmul.f32 %v2212_v29, %v4916_v30  ;;  %v2292_v35 = vmul.f32 %v2212_v29, %v4922_v34  ;;  %v2291_v37 = vmul.f32 %v2212_v29, %v4928_v36  ;;  %v3282_v31 = vld [vmem:[%s5194_s1] ss:$0 sm:$0xff]  ;;  %s3293_s1 = sshll.u32 %s5169_s24, 7 }
 0x6ba   : > { %p5205_p11 = scmp.ne.s32.totalorder %s5204_s9, 0 }
 0x6bb   : > { %3512 = vmatpush3.xpose.msk.msra.mxu1 %vm1359_vm1, %v2294_v32 }
 0x6bc   : > { %3513 = vmatprep.subr.mxu1 %v4292_v0 }
 0x6bf   : > { %3514 = vmatpush3.xpose.msk.msra.mxu1 %vm1359_vm1, %v2293_v33 }
 0x6c0   : > { %3515 = vmatprep.subr.mxu1 %v4292_v0 }
 0x6c3   : > { %3516 = vmatpush3.xpose.msk.msra.mxu1 %vm1359_vm1, %v2292_v35 }
 0x6c4   : > { %3517 = vmatprep.subr.mxu1 %v4292_v0 }
 0x6c7   : > { %3518 = vmatpush3.xpose.msk.msra.mxu1 %vm1359_vm1, %v2291_v37 }
 0x6c8   : > { %3544 = vmatprep.subr.mxu1 %v4292_v0 }
 0x73d   : > { %v2003_v8 = vpop.xlane.xlu0 %2002 }
 0x73e   : > { %v2005_v18 = vmul.f32 0.03125, %v2003_v8 }
 0x740   : > { %v2006_v19 = vsub.f32 %v1998_v11, %v2005_v18 }
 0x742   : > { %v2007_v20 = vmul.f32 %v2006_v19, %v2006_v19 }
 0x744   : > { %v2008_v21 = vsel %vm1359_vm1, %v2007_v20, 0.0 }
 0x745   : > { %2009 = vadd.xlane.f32.xlu0 %v2008_v21 }
 0x75b   : > { %1315 = vrot.lane.b32.xlu0 %v1310_v47, %s4296_s27  ;;  %v2824_v47 = vld [vmem:[%s5196_s8 + $0x30] sm:$0xff]  ;;  %s5198_s27 = sld [smem:[#allocation56_spill]] }
 0x7ce   : > { %v2010_v38 = vpop.xlane.xlu0 %2009 }
 0x7cf   : > { %v2011_v39 = vmul.f32 0.03125, %v2010_v38 }
 0x7d1   : > { %v2012_v40 = vadd.f32 1e-05, %v2011_v39 }
 0x7d2   : > { %v1316_v55 = vpop.permute.xlu0 %1315 }
 0x7d3   : > { %3793 = vrsqrt.f32 %v2012_v40  ;;  %v1322_v56 = vsel %vm1305_vm3, %v1321_v54, %v1316_v55  ;;  %v3284_v55 = vld [vmem:[%s5197_s20] ss:$0 sm:$0xff] }
 0x7d4   : > { %v1323_v58 = vsel %vm1307_vm4, %v1322_v56, %v1319_v57  ;;  %v3285_v57 = vld [vmem:[%s5198_s27] ss:$0 sm:$0xff]  ;;  %s2950_s27 = scalar_lea.hbm %s5203_s30, %s3293_s1 }
 0x7d5   : > { %vm1324_vm7 = vcmp.eq.f32.partialorder %v1323_v58, 0.0 }
 0x7e0   : > { %v3794_v41 = vpop.eup %3793 }
 0x7e1   : > { %v2014_v43 = vmul.f32 %v3794_v41, %v2006_v19 }
 0x7e3   : > { %v2021_v45 = vmul.f32 %v3262_v42, %v2014_v43  ;;  %v2736_v42 = vld [vmem:[#allocation22 + $0x18] sm:$0xff]  ;;  %v2735_v43 = vld [vmem:[#allocation22 + $0x10] sm:$0xff] }
 0x7e5   : > { %v4938_v46 = vadd.f32 %v3263_v44, %v2021_v45  ;;  %v2734_v44 = vld [vmem:[#allocation22 + $0x8] sm:$0xff]  ;;  %v2733_v45 = vld [vmem:[#allocation22] sm:$0xff] }
 0x7e7   : > { %3487 = vmatmul.mubr.msk.f32.vlgmr.msra.gmra.mxu0 %vm1359_vm1, %v4938_v46 }
 0x7e8   : > { %3508 = vmatprep.mubr.msk.f32.mxu0 %vm4293_vm0, %v4292_v0  ;;  %3501 = vmatpush3.msra.mxu0 %v2050_v52 }
 0x7e9   : > { %3502 = vmatprep.subr.mxu0 %v4292_v0 }
 0x7ea   : > { %3503 = vmatpush3.msra.mxu0 %v2049_v63  ;;  %v3286_v63 = vld [vmem:[%s5199_s2] ss:$0 sm:$0xff]  ;;  %s2939_s2 = scalar_lea.sflag [#allocation4], %s4726_s4 }
 0x7eb   : > { %3504 = vmatprep.subr.mxu0 %v4292_v0 }
 0x7ec   : > { %3505 = vmatpush3.msra.mxu0 %v2048_v1 }
 0x7ed   : > { %3506 = vmatprep.subr.mxu0 %v4292_v0 }
 0x7ee   : > { %3507 = vmatpush3.msra.mxu0 %v2047_v2 }
 0x7ef   : > { %3509 = vmatmul.mubr.msk.f32.vlgmr.msra.gmra.mxu0 %vm1359_vm1, %v4898_v17  ;;  %3522 = vmatprep.subr.mxu0 %v4292_v0 }
 0x7f0   : > { %3523 = vmatpush3.msra.mxu0 %v2036_v3  ;;  %3530 = vmatprep.mubr.msk.f32.mxu0 %vm4293_vm0, %v4292_v0 }
 0x7f1   : > { %3524 = vmatprep.subr.mxu0 %v4292_v0 }
 0x7f2   : > { %3525 = vmatpush3.msra.mxu0 %v2035_v4 }
 0x7f3   : > { %3526 = vmatprep.subr.mxu0 %v4292_v0 }
 0x7f4   : > { %3527 = vmatpush3.msra.mxu0 %v2034_v5 }
 0x7f5   : > { %3528 = vmatprep.subr.mxu0 %v4292_v0 }
 0x7f6   : > { %3529 = vmatpush3.msra.mxu0 %v2033_v6 }
 0x7f7   : > { %3533 = vmatprep.subr.mxu0 %v4292_v0 }
 0x8a7   : > { %v2132_v49 = vpop.f32.mrf.mxu0 }
 0x8a8   : > { %v2133_v50 = vadd.f32 %v3264_v48, %v2132_v49  ;;  %v2823_v48 = vld [vmem:[%s5196_s8 + $0x28] sm:$0xff]  ;;  %v2822_v49 = vld [vmem:[%s5196_s8 + $0x20] sm:$0xff] }
 0x8a9   : > { %v3488_v51 = vpop.f32.mrf.mxu0 }
 0x8aa   : > { %3520 = vmatmul.mubr.msk.f32.vlgmr.msra.gmra.mxu1 %vm1359_vm1, %v2133_v50  ;;  %v2821_v50 = vld [vmem:[%s5196_s8 + $0x18] sm:$0xff] }
 0x8ab   : > { %3552 = vmatprep.mubr.msk.f32.mxu1 %vm4293_vm0, %v4292_v0 }
 0x8af   : > { %v2287_v13 = vpop.f32.mrf.mxu0 }
 0x8b0   : > { %v2288_v14 = vadd.f32 %v3268_v12, %v2287_v13 }
 0x8b1   : > { %v3510_v15 = vpop.f32.mrf.mxu0 }
 0x8b2   : > { %v2298_v16 = vmul.f32 %v2288_v14, %v4913_v27  ;;  %v2297_v17 = vmul.f32 %v2288_v14, %v4916_v30  ;;  %v2296_v8 = vmul.f32 %v2288_v14, %v4922_v34  ;;  %v2295_v18 = vmul.f32 %v2288_v14, %v4928_v36  ;;  %v2053_v27 = vld [vmem:[#allocation20 + $0x8] sm:$0xff] }
 0x8b4   : > { %3545 = vmatpush3.msra.mxu1 %v2298_v16 }
 0x8b5   : > { %3546 = vmatprep.subr.mxu1 %v4292_v0 }
 0x8b6   : > { %3547 = vmatpush3.msra.mxu1 %v2297_v17 }
 0x8b7   : > { %3548 = vmatprep.subr.mxu1 %v4292_v0 }
 0x8b8   : > { %3549 = vmatpush3.msra.mxu1 %v2296_v8 }
 0x8b9   : > { %3550 = vmatprep.subr.mxu1 %v4292_v0 }
 0x8ba   : > { %3551 = vmatpush3.msra.mxu1 %v2295_v18 }
 0x8bb   : > { %3555 = vmatprep.subr.mxu1 %v4292_v0 }
 0x96a   : > { %v2380_v59 = vpop.f32.mrf.mxu1 }
 0x96b   : > { %v2384_v60 = vsel %vm1324_vm7, -1e+09, %v2380_v59 }
 0x96c   : > { %v3521_v61 = vpop.f32.mrf.mxu1  ;;  %v2385_v62 = vsel %vm1359_vm1, %v2384_v60, -inf }
 0x96d   : > { %2386 = vmax.xlane.f32.xlu1 %v2385_v62  ;;  %v2819_v61 = vld [vmem:[%s5196_s8 + $0x8] sm:$0xff]  ;;  %v2818_v62 = vld [vmem:[%s5196_s8] sm:$0xff] }
 0x9f6   : > { %v2387_v7 = vpop.xlane.xlu1 %2386 }
 0x9f7   : > { %v2388_v9 = vsub.f32 %v2384_v60, %v2387_v7  ;;  %v2820_v60 = vld [vmem:[%s5196_s8 + $0x10] sm:$0xff] }
 0x9f9   : > { %v2389_v10 = vmul.f32 1.442695, %v2388_v9 }
 0x9fb   : > { %3795 = vpow2.f32 %v2389_v10 }
 0xa08   : > { %v3796_v11 = vpop.eup %3795 }
 0xa09   : > { %3531 = vmatmul.mubr.msk.f32.vlgmr.msra.gmra.mxu0 %vm1359_vm1, %v3796_v11 }
 0xa0a   : > { %3534 = vmatpush3.xpose.msk.msra.mxu0 %vm1759_vm6, %v2036_v3  ;;  %3541 = vmatprep.mubr.msk.f32.mxu0 %vm4293_vm0, %v4292_v0 }
 0xa0b   : > { %3535 = vmatprep.subr.mxu0 %v4292_v0 }
 0xa0e   : > { %3536 = vmatpush3.xpose.msk.msra.mxu0 %vm1759_vm6, %v2035_v4 }
 0xa0f   : > { %3537 = vmatprep.subr.mxu0 %v4292_v0 }
 0xa12   : > { %3538 = vmatpush3.xpose.msk.msra.mxu0 %vm1759_vm6, %v2034_v5  ;;  %v3288_v5 = vld [vmem:[%s5200_s7] ss:$0 sm:$0xff] }
 0xa13   : > { %3539 = vmatprep.subr.mxu0 %v4292_v0 }
 0xa16   : > { %3540 = vmatpush3.xpose.msk.msra.mxu0 %vm1759_vm6, %v2033_v6 }
 0xa17   : > { %3566 = vmatprep.subr.mxu0 %v4292_v0 }
 0xac9   : > { %v2460_v19 = vpop.f32.mrf.mxu0 }
 0xaca   : > { %3797 = vrcp.f32 %v2460_v19  ;;  %v3290_v19 = vld [vmem:[%s5201_s28] ss:$0 sm:$0xff]  ;;  %s4155_s28 = scalar_lea.vmem %s4154_s5, 256 }
 0xacb   : > { %v3532_v20 = vpop.f32.mrf.mxu0 }
 0xad7   : > { %v3798_v21 = vpop.eup %3797 }
 0xad8   : > { %3542 = vmatmul.mubr.msk.f32.vlgmr.msra.gmra.mxu0 %vm1759_vm6, %v3798_v21  ;;  %v3291_v21 = vld [vmem:[%s5202_s22] ss:$0 sm:$0xff] }
 0xad9   : > { %3574 = vmatprep.mubr.msk.f32.mxu0 %vm4293_vm0, %v4292_v0  ;;  %3567 = vmatpush3.msra.mxu0 %v2736_v42 }
 0xada   : > { %3568 = vmatprep.subr.mxu0 %v4292_v0 }
 0xadb   : > { %3569 = vmatpush3.msra.mxu0 %v2735_v43 }
 0xadc   : > { %3570 = vmatprep.subr.mxu0 %v4292_v0 }
 0xadd   : > { %3571 = vmatpush3.msra.mxu0 %v2734_v44 }
 0xade   : > { %3572 = vmatprep.subr.mxu0 %v4292_v0 }
 0xadf   : > { %3573 = vmatpush3.msra.mxu0 %v2733_v45 }
 0xb98   : > { %v2546_v22 = vpop.f32.mrf.mxu0 }
 0xb99   : > { %v2550_v23 = vmul.f32 %v3796_v11, %v2546_v22 }
 0xb9a   : > { %v3543_v25 = vpop.f32.mrf.mxu0 }
 0xb9b   : > { %3553 = vmatmul.mubr.msk.f32.vlgmr.msra.gmra.mxu1 %vm1359_vm1, %v2550_v23 }
 0xb9c   : > { %3556 = vmatpush3.msra.mxu1 %v2055_v24  ;;  %3563 = vmatprep.mubr.msk.f32.mxu1 %vm4293_vm0, %v4292_v0 }
 0xb9d   : > { %3557 = vmatprep.subr.mxu1 %v4292_v0 }
 0xb9e   : > { %3558 = vmatpush3.msra.mxu1 %v2054_v26 }
 0xb9f   : > { %3559 = vmatprep.subr.mxu1 %v4292_v0 }
 0xba0   : > { %3560 = vmatpush3.msra.mxu1 %v2053_v27 }
 0xba1   : > { %3561 = vmatprep.subr.mxu1 %v4292_v0 }
 0xba2   : > { %3562 = vmatpush3.msra.mxu1 %v2052_v28 }
 0xba3   : > { %3577 = vmatprep.subr.mxu1 %v4292_v0 }
 0xc5b   : > { %v2620_v29 = vpop.f32.mrf.mxu1 }
 0xc5c   : > { %3564 = vmatmul.mubr.msk.f32.vlgmr.msra.gmra.mxu1 %vm1359_vm1, %v2620_v29 }
 0xc5d   : > { %v3554_v30 = vpop.f32.mrf.mxu1  ;;  %3593 = vmatprep.mubr.msk.f32.mxu1 %vm4293_vm0, %v4292_v0 }
 0xd1c   : > { %v2699_v32 = vpop.f32.mrf.mxu1 }
 0xd1d   : > { %v2700_v33 = vadd.f32 %v3282_v31, %v2699_v32 }
 0xd1e   : > { %v3565_v34 = vpop.f32.mrf.mxu1 }
 0xd1f   : > { %v2703_v35 = vadd.f32 %v2700_v33, %v4938_v46  ;;  %v2825_v46 = vld [vmem:[%s5195_s15 + $0x38] sm:$0xff]  ;;  %s1289_s15 = scalar_lea.vmem [#allocation23], %s4729_s26 }
 0xd20   : > { %3578 = vmatpush3.msra.mxu1 %v2825_v46  ;;  %s2952_s20 = sshll.u32 %s1289_s15, 4  ;;  %s2953_s20 = int_to_ptr.vmem [resolvable:$true] %s2952_s20 }
 0xd21   : > { %v2706_v36 = vsel %vm1359_vm1, %v2703_v35, 0.0  ;;  %3579 = vmatprep.subr.mxu1 %v4292_v0  ;;  %s4149_s7 = scalar_lea.vmem %s2953_s20, 128  ;;  %p4156_p6 = scmp.lt.s32.totalorder %s2953_s20, %s4154_s5 }
 0xd22   : > { %2707 = vadd.xlane.f32.xlu0 %v2706_v36  ;;  %3580 = vmatpush3.msra.mxu1 %v2824_v47  ;;  %p4150_p0 = scmp.ne.s32.totalorder %s2953_s20, %s4149_s7  ;;  %p4157_p10 = scmp.lt.s32.totalorder %s4155_s28, %s4149_s7 }
 0xd23   : > { %3581 = vmatprep.subr.mxu1 %v4292_v0 }
 0xd24   : > { %3582 = vmatpush3.msra.mxu1 %v2823_v48  ;;  %p4151_p8 = pnand %p4150_p0, %p5205_p11  ;;  %p4158_p4 = por %p4157_p10, %p4156_p6 }
 0xd25   : > { %3583 = vmatprep.subr.mxu1 %v4292_v0 }
 0xd26   : > { %3584 = vmatpush3.msra.mxu1 %v2822_v49  ;;  %p4152_p1 = pneg %p4151_p8 }
 0xd27   : > { %3585 = vmatprep.subr.mxu1 %v4292_v0 }
 0xd28   : > { %3586 = vmatpush3.msra.mxu1 %v2821_v50  ;;  %p4159_p3 = pnand %p4158_p4, %p4152_p1 }
 0xd29   : > { %3587 = vmatprep.subr.mxu1 %v4292_v0 }
 0xd2a   : > { %3588 = vmatpush3.msra.mxu1 %v2820_v60 }
 0xd2b   : > { %3589 = vmatprep.subr.mxu1 %v4292_v0 }
 0xd2c   : > { %3590 = vmatpush3.msra.mxu1 %v2819_v61 }
 0xd2d   : > { %3591 = vmatprep.subr.mxu1 %v4292_v0 }
 0xd2e   : > { %3592 = vmatpush3.msra.mxu1 %v2818_v62 }
 0xdab   : > { %v2708_v37 = vpop.xlane.xlu0 %2707 }
 0xdac   : > { %v2709_v38 = vmul.f32 0.03125, %v2708_v37 }
 0xdae   : > { %v2710_v39 = vsub.f32 %v2703_v35, %v2709_v38 }
 0xdb0   : > { %v2711_v40 = vmul.f32 %v2710_v39, %v2710_v39 }
 0xdb2   : > { %v2712_v41 = vsel %vm1359_vm1, %v2711_v40, 0.0 }
 0xdb3   : > { %2713 = vadd.xlane.f32.xlu0 %v2712_v41 }
 0xe3c   : > { %v2714_v51 = vpop.xlane.xlu0 %2713 }
 0xe3d   : > { %v2715_v52 = vmul.f32 0.03125, %v2714_v51 }
 0xe3f   : > { %v2716_v53 = vadd.f32 1e-05, %v2715_v52 }
 0xe41   : > { %3799 = vrsqrt.f32 %v2716_v53 }
 0xe4e   : > { %v3800_v54 = vpop.eup %3799 }
 0xe4f   : > { %v2718_v56 = vmul.f32 %v3800_v54, %v2710_v39 }
 0xe51   : > { %v2725_v58 = vmul.f32 %v3284_v55, %v2718_v56 }
 0xe53   : > { %v2732_v59 = vadd.f32 %v3285_v57, %v2725_v58 }
 0xe55   : > { %3575 = vmatmul.mubr.msk.f32.vlgmr.msra.gmra.mxu0 %vm1359_vm1, %v2732_v59 }
 0xf15   : > { %v2813_v1 = vpop.f32.mrf.mxu0 }
 0xf16   : > { %v2814_v2 = vadd.f32 %v3286_v63, %v2813_v1 }
 0xf17   : > { %v3576_v3 = vpop.f32.mrf.mxu0 }
 0xf18   : > { %v2817_v4 = vmax.f32 %v2814_v2, 0.0 }
 0xf1a   : > { %3594 = vmatmul.mubr.msk.f32.vlgmr.msra.gmra.mxu1 %vm2833_vm8, %v2817_v4 }
 0xfda   : > { %v2903_v6 = vpop.f32.mrf.mxu1 }
 0xfdb   : > { %v2904_v7 = vadd.f32 %v3288_v5, %v2903_v6 }
 0xfdc   : > { %v3595_v9 = vpop.f32.mrf.mxu1 }
 0xfdd   : > { %v2907_v10 = vadd.f32 %v2904_v7, %v2732_v59 }
 0xfdf   : > { %v2910_v11 = vsel %vm1359_vm1, %v2907_v10, 0.0 }
 0xfe0   : > { %2911 = vadd.xlane.f32.xlu1 %v2910_v11 }
0x1069   : > { %v2912_v0 = vpop.xlane.xlu1 %2911 }
0x106a   : > { %v2913_v12 = vmul.f32 0.03125, %v2912_v0 }
0x106c   : > { %v2914_v13 = vsub.f32 %v2907_v10, %v2913_v12 }
0x106e   : > { %v2915_v14 = vmul.f32 %v2914_v13, %v2914_v13 }
0x1070   : > { %v2916_v15 = vsel %vm1359_vm1, %v2915_v14, 0.0 }
0x1071   : > { %2917 = vadd.xlane.f32.xlu0 %v2916_v15 }
0x10fa   : > { %v2918_v16 = vpop.xlane.xlu0 %2917 }
0x10fb   : > { %v2919_v17 = vmul.f32 0.03125, %v2918_v16 }
0x10fd   : > { %v2920_v8 = vadd.f32 1e-05, %v2919_v17 }
0x10ff   : > { %3801 = vrsqrt.f32 %v2920_v8 }
0x110c   : > { %v3802_v18 = vpop.eup %3801 }
0x110d   : > { %v2922_v20 = vmul.f32 %v3802_v18, %v2914_v13 }
0x110f   : > { %v2929_v22 = vmul.f32 %v3290_v19, %v2922_v20 }
0x1111   : > { %v2936_v23 = vadd.f32 %v3291_v21, %v2929_v22 }
0x1113   : > { %2937 = vst.msk [vmem:[%s1289_s15] sm:$0xff] %vm1359_vm1, %v2936_v23 }
0x1114   : > { %4162 = shalt.err (!%p4159_p3)
}
0x1115   : > { %s4163_s26 = scalar_lea.hbm %s2950_s27, 128  ;;  %s4167_s4 = scalar_lea.hbm %s5203_s30, 256 }
0x1116   : > { %p4164_p12 = scmp.ne.s32.totalorder %s2950_s27, %s4163_s26  ;;  %p4168_p5 = scmp.lt.s32.totalorder %s2950_s27, %s5203_s30 }
0x1117   : > { %p4169_p7 = scmp.lt.s32.totalorder %s4167_s4, %s4163_s26 }
0x1118   : > { %p4165_p13 = pnand %p4164_p12, %p5205_p11 }
0x1119   : > { %p4170_p2 = por %p4169_p7, %p4168_p5 }
0x111a   : > { %p4166_p9 = pneg %p4165_p13 }
0x111c   : > { %p4171_p0 = pnand %p4170_p2, %p4166_p9 }
0x111e   : > { %4174 = shalt.err (!%p4171_p0)
}
0x111f   : > { %3640 = dma.vmem_to_hbm [thread:$0]  (%p5205_p11), %s2953_s20, 128, %s2950_s27, %s2939_s2  }
0x1120 PF: > { %s5206_s5 = sld [smem:[#allocation63_spill]]  ;;  %p5209_p1 = scmp.ge.s32.totalorder %s4241_s0, 2 }
0x1121   : > { %s5207_s3 = sld [smem:[#allocation68_spill]] }
0x1126   : > { %s2964_s24 = sand.u32 1, %s5206_s5  }
0x1127   : > { %p5208_p8 = scmp.ne.s32.totalorder %s5207_s3, 0  ;;  %s2965_s22 = scalar_lea.sflag [#allocation4], %s2964_s24 }
0x1129   : > { %p3684_p6 = pnand %p5209_p1, %p5208_p8 }
0x112b   : > { %p3685_p10 = pneg %p3684_p6 }
0x112d   : > { %4224 = dma.done.wait (%p3685_p10), %s2965_s22, 128  }
0x112e   : > { %4226 = vsyncadd (%p3685_p10), %s2965_s22, 4294967168  ;;  %s5210_s0 = sld [smem:[#allocation65_spill]]  ;;  %s5212_s15 = smov %s4233_s16 }
0x112f   : > { %s5211_s1 = sld [smem:[#allocation66_spill]]  ;;  %s5213_s16 = smov %s4237_s18 }
0x1134   : > { %p92_p4 = scmp.ge.s32.totalorder %s5210_s0, 4  }
0x1135   : > { %s5214_s18 = smov %s5211_s1 }
0x1136   :  { %94 = sbr.rel (!%p92_p4) target bundleno = 84 (0x54), region = 308 }
0x113b   :  { %2970 = vsyncpa [#allocation3], 1 }
0x113c   :  { %2972 = vsyncpa [#allocation3 + $0x1], 1 }
0x113d   :  { %2973 = vsyncpa [#allocation6], 1 }
0x113e   :  { %2975 = vsyncpa [#allocation6 + $0x1], 1 }
0x113f   :  { %2976 = vsyncpa [#allocation9], 1 }
0x1140   :  { %2978 = vsyncpa [#allocation9 + $0x1], 1 }
0x1141   :  { %2979 = vsyncpa [#allocation12], 1 }
0x1142   :  { %2980 = vsyncpa [#allocation15], 1 }
0x1143   :  { %2981 = vsyncpa [#allocation18], 1 }
0x1144   :  { %2982 = vsyncpa [#allocation21], 1 }
0x1145   :  { %2983 = vsyncpa [#allocation4], 1 }
0x1146   :  { %2985 = vsyncpa [#allocation4 + $0x1], 1 }

</bundles_post_ra>
